<compile_context>
chip_gen: v6e
topology: v6e:2x2x1
jax: 0.10.0
libtpu: 0.0.40
codegen_flags: <defaults>
</compile_context>

<pallas_src>
import functools

import jax
import jax.numpy as jnp
from jax import lax
from jax.experimental import pallas as pl
from jax.experimental.pallas import tpu as pltpu


def _downsample_conv3d_kernel(z_ref, w_ref, b_ref, o_ref, lhs_ref, *, ho, wo):
    """One grid step = one (n, do) output plane; all 27 taps in a single MXU matmul.

    z_ref  : (1, 1, 12, ho+1, wo+1, cin) bf16; axis 2 = 4*kd + 2*(kh%2) + (kw%2) parity slab
    w_ref  : (27*cin, cout_p)            bf16, VMEM-resident, rows ordered (kd, kh, kw, ci)
    b_ref  : (1, cout_p)                 f32,  VMEM-resident
    o_ref  : (1, 1, ho*wo, cout_p)
    lhs_ref: (ho*wo, 27*cin)             bf16 im2col scratch
    """
    cin = z_ref.shape[-1]

    # Fused im2col: each of the 27 taps is a contiguous window of one parity slab;
    # gather it once into the scratch (pays the window relayout a single time).
    for kd in range(3):
        for kh in range(3):
            ph, qh = kh % 2, kh // 2
            for kw in range(3):
                pw, qw = kw % 2, kw // 2
                t = (kd * 3 + kh) * 3 + kw
                slab = z_ref[0, 0, 4 * kd + 2 * ph + pw]           # (ho+1, wo+1, cin)
                lhs_ref[:, t * cin:(t + 1) * cin] = (
                    slab[qh:qh + ho, qw:qw + wo, :].reshape(ho * wo, cin))

    # Single wide-K matmul (K = 27*cin), f32 accumulation, bias add, lane-dense store.
    acc = jnp.dot(lhs_ref[...], w_ref[...], preferred_element_type=jnp.float32)
    acc = acc + b_ref[...]
    o_ref[...] = acc.reshape(o_ref.shape).astype(o_ref.dtype)


def downsample_forward(x, weight, bias, *, compute_dtype=jnp.bfloat16):
    """Equivalent of nn.Conv3d(dim, dim, 3, stride=2, padding=1)(x).

    x:      (N, Cin, D, H, W)     float32
    weight: (Cout, Cin, 3, 3, 3)  float32 (PyTorch OIDHW)
    bias:   (Cout,)               float32
    returns (N, Cout, Do, Ho, Wo)
    """
    n, cin, d, h, w = x.shape
    cout = weight.shape[0]
    do = (d - 1) // 2 + 1
    ho = (h - 1) // 2 + 1
    wo = (w - 1) // 2 + 1
    dp = d + 2

    # Lane-pad Cout to a full 128-lane vreg when the channel count is tiny so the
    # output store is unmasked / lane-dense.
    cout_p = 128 if cout < 128 else cout

    # ---- wrapper glue (cheap O(input) passes) -------------------------------------------
    # Pad + H/W parity split so every conv tap becomes a contiguous window:
    #   z[n, dpad, 2*ph+pw, i, j, c] == xpad[n, dpad, 2*i+ph, 2*j+pw, c]
    x_ndhwc = jnp.transpose(x, (0, 2, 3, 4, 1))
    x_pad = jnp.pad(
        x_ndhwc,
        ((0, 0), (1, 1), (1, 1 + (2 * ho - h)), (1, 1 + (2 * wo - w)), (0, 0)))
    z = x_pad.reshape(n, dp, ho + 1, 2, wo + 1, 2, cin)
    z = jnp.transpose(z, (0, 1, 3, 5, 2, 4, 6)).reshape(n, dp, 4, ho + 1, wo + 1, cin)
    # Regroup depth so each output depth index owns its 3 depth taps contiguously
    # (folds the kd reduction out of the grid; ~1.5x duplication of the padded input).
    dsel = 2 * jnp.arange(do)[:, None] + jnp.arange(3)[None, :]        # (do, 3)
    z3 = z[:, dsel].reshape(n, do, 12, ho + 1, wo + 1, cin).astype(compute_dtype)

    # Full weight as one resident (27*cin, cout_p) matrix, rows ordered (kd, kh, kw, ci).
    w_mat = jnp.transpose(weight, (2, 3, 4, 1, 0)).reshape(27 * cin, cout)
    w_mat = jnp.pad(w_mat, ((0, 0), (0, cout_p - cout))).astype(compute_dtype)
    b_mat = jnp.pad(bias, (0, cout_p - cout)).reshape(1, cout_p).astype(jnp.float32)

    # VMEM budget from the actual block footprint, clamped under v7x's 64 MiB/TC.
    a_b = jnp.dtype(compute_dtype).itemsize
    o_b = jnp.dtype(x.dtype).itemsize
    z_blk = 12 * (ho + 1) * (wo + 1) * cin * a_b
    w_blk = 27 * cin * cout_p * a_b
    o_blk = ho * wo * cout_p * o_b
    lhs_blk = ho * wo * 27 * cin * a_b
    acc_tmp = ho * wo * cout_p * 4
    est = 2 * (z_blk + o_blk) + w_blk + cout_p * 4 + lhs_blk + acc_tmp
    vmem_limit = int(min(max(2 * est, 32 * 2 ** 20), 48 * 2 ** 20))

    kernel = functools.partial(_downsample_conv3d_kernel, ho=ho, wo=wo)

    out = pl.pallas_call(
        kernel,
        out_shape=jax.ShapeDtypeStruct((n, do, ho * wo, cout_p), x.dtype),
        grid=(n, do),
        in_specs=[
            pl.BlockSpec((1, 1, 12, ho + 1, wo + 1, cin),
                         lambda ni, di: (ni, di, 0, 0, 0, 0)),
            pl.BlockSpec((27 * cin, cout_p), lambda ni, di: (0, 0)),   # resident weight
            pl.BlockSpec((1, cout_p), lambda ni, di: (0, 0)),          # resident bias
        ],
        out_specs=pl.BlockSpec((1, 1, ho * wo, cout_p),
                               lambda ni, di: (ni, di, 0, 0)),
        scratch_shapes=[pltpu.VMEM((ho * wo, 27 * cin), compute_dtype)],
        compiler_params=pltpu.CompilerParams(
            dimension_semantics=("parallel", "parallel"),
            vmem_limit_bytes=vmem_limit),
    )(z3, w_mat, b_mat)

    # TODO(synk): for very large Ho*Wo*Cin planes (block footprint > ~48 MiB, e.g. 64x64
    # planes at cin=512 on v7x) add an Ho-blocking grid axis with a +1 halo row so the
    # per-step z/output blocks stay within the per-core VMEM budget.

    out = out.reshape(n, do, ho, wo, cout_p)[..., :cout]
    return jnp.transpose(out, (0, 4, 1, 2, 3))            # back to NCDHW module interface


def _reference_conv3d(x, weight, bias):
    y = lax.conv_general_dilated(
        x, weight,
        window_strides=(2, 2, 2),
        padding=((1, 1), (1, 1), (1, 1)),
        dimension_numbers=("NCDHW", "OIDHW", "NCDHW"),
    )
    return y + bias[None, :, None, None, None]


if __name__ == "__main__":
    key = jax.random.PRNGKey(0)
    k_x, k_w, k_b = jax.random.split(key, 3)

    # Small shapes consistent with Downsample: batch=2, dim=4, spatial 8x8x8.
    n, dim, d, h, w = 2, 4, 8, 8, 8
    x = jax.random.normal(k_x, (n, dim, d, h, w), dtype=jnp.float32)
    weight = 0.1 * jax.random.normal(k_w, (dim, dim, 3, 3, 3), dtype=jnp.float32)
    bias = 0.1 * jax.random.normal(k_b, (dim,), dtype=jnp.float32)

    fwd = jax.jit(downsample_forward)
    y = jax.block_until_ready(fwd(x, weight, bias))

    y_ref = _reference_conv3d(x, weight, bias)
    assert y.shape == (n, dim, 4, 4, 4), y.shape
    err = float(jnp.max(jnp.abs(y - y_ref)))
    # bf16 activations/weights with f32 accumulation -> loosened tolerance.
    assert jnp.allclose(y, y_ref, rtol=5e-2, atol=5e-2), err

    print("KERNEL_OK")
</pallas_src>

<mosaic_0001>
module attributes {stable_mosaic.version = 11 : i64} {
  func.func @_downsample_conv3d_kernel(%arg0: i32, %arg1: i32, %arg2: memref<1x1x12x5x5x4xbf16, #tpu.memory_space<vmem>>, %arg3: memref<108x128xbf16, #tpu.memory_space<vmem>>, %arg4: memref<1x128xf32, #tpu.memory_space<vmem>>, %arg5: memref<1x1x16x128xf32, #tpu.memory_space<vmem>>, %arg6: memref<16x108xbf16, #tpu.memory_space<vmem>>) attributes {dimension_semantics = [#tpu.dimension_semantics<parallel>, #tpu.dimension_semantics<parallel>], iteration_bounds = array<i64: 2, 4>, scalar_prefetch = 0 : i64, scratch_operands = 1 : i64, tpu.core_type = #tpu.core_type<tc>, window_params = [{transform_indices = @transform_0, window_bounds = array<i64: 1, 1, 12, 5, 5, 4>}, {pipeline_mode = #tpu.pipeline_mode<synchronous>, transform_indices = @transform_1, window_bounds = array<i64: 108, 128>}, {pipeline_mode = #tpu.pipeline_mode<synchronous>, transform_indices = @transform_2, window_bounds = array<i64: 1, 128>}, {transform_indices = @transform_3, window_bounds = array<i64: 1, 1, 16, 128>}]} {
    %c0 = arith.constant 0 : index
    %c0_0 = arith.constant 0 : index
    %c0_1 = arith.constant 0 : index
    %c0_2 = arith.constant 0 : index
    %c0_3 = arith.constant 0 : index
    %c0_4 = arith.constant 0 : index
    %0 = vector.load %arg2[%c0, %c0_0, %c0_1, %c0_2, %c0_3, %c0_4] : memref<1x1x12x5x5x4xbf16, #tpu.memory_space<vmem>>, vector<1x1x1x5x5x4xbf16>
    %1 = vector.shape_cast %0 : vector<1x1x1x5x5x4xbf16> to vector<5x5x4xbf16>
    %2 = vector.extract_strided_slice %1 {offsets = [0, 0, 0], sizes = [4, 4, 4], strides = [1, 1, 1]} : vector<5x5x4xbf16> to vector<4x4x4xbf16>
    %3 = vector.shape_cast %2 : vector<4x4x4xbf16> to vector<16x4xbf16>
    %c0_5 = arith.constant 0 : index
    %c0_6 = arith.constant 0 : index
    %4 = vector.load %arg6[%c0_5, %c0_6] : memref<16x108xbf16, #tpu.memory_space<vmem>>, vector<16x4xbf16>
    tpu.vector_store %arg6[%c0_5, %c0_6], %3 {strides = array<i32>} : memref<16x108xbf16, #tpu.memory_space<vmem>>, vector<16x4xbf16>,
    %c0_7 = arith.constant 0 : index
    %c0_8 = arith.constant 0 : index
    %c1 = arith.constant 1 : index
    %c0_9 = arith.constant 0 : index
    %c0_10 = arith.constant 0 : index
    %c0_11 = arith.constant 0 : index
    %5 = vector.load %arg2[%c0_7, %c0_8, %c1, %c0_9, %c0_10, %c0_11] : memref<1x1x12x5x5x4xbf16, #tpu.memory_space<vmem>>, vector<1x1x1x5x5x4xbf16>
    %6 = vector.shape_cast %5 : vector<1x1x1x5x5x4xbf16> to vector<5x5x4xbf16>
    %7 = vector.extract_strided_slice %6 {offsets = [0, 0, 0], sizes = [4, 4, 4], strides = [1, 1, 1]} : vector<5x5x4xbf16> to vector<4x4x4xbf16>
    %8 = vector.shape_cast %7 : vector<4x4x4xbf16> to vector<16x4xbf16>
    %c0_12 = arith.constant 0 : index
    %c4 = arith.constant 4 : index
    %9 = vector.load %arg6[%c0_12, %c4] : memref<16x108xbf16, #tpu.memory_space<vmem>>, vector<16x4xbf16>
    tpu.vector_store %arg6[%c0_12, %c4], %8 {strides = array<i32>} : memref<16x108xbf16, #tpu.memory_space<vmem>>, vector<16x4xbf16>,
    %c0_13 = arith.constant 0 : index
    %c0_14 = arith.constant 0 : index
    %c0_15 = arith.constant 0 : index
    %c0_16 = arith.constant 0 : index
    %c0_17 = arith.constant 0 : index
    %c0_18 = arith.constant 0 : index
    %10 = vector.load %arg2[%c0_13, %c0_14, %c0_15, %c0_16, %c0_17, %c0_18] : memref<1x1x12x5x5x4xbf16, #tpu.memory_space<vmem>>, vector<1x1x1x5x5x4xbf16>
    %11 = vector.shape_cast %10 : vector<1x1x1x5x5x4xbf16> to vector<5x5x4xbf16>
    %12 = vector.extract_strided_slice %11 {offsets = [0, 1, 0], sizes = [4, 4, 4], strides = [1, 1, 1]} : vector<5x5x4xbf16> to vector<4x4x4xbf16>
    %13 = vector.shape_cast %12 : vector<4x4x4xbf16> to vector<16x4xbf16>
    %c0_19 = arith.constant 0 : index
    %c8 = arith.constant 8 : index
    %14 = vector.load %arg6[%c0_19, %c8] : memref<16x108xbf16, #tpu.memory_space<vmem>>, vector<16x4xbf16>
    tpu.vector_store %arg6[%c0_19, %c8], %13 {strides = array<i32>} : memref<16x108xbf16, #tpu.memory_space<vmem>>, vector<16x4xbf16>,
    %c0_20 = arith.constant 0 : index
    %c0_21 = arith.constant 0 : index
    %c2 = arith.constant 2 : index
    %c0_22 = arith.constant 0 : index
    %c0_23 = arith.constant 0 : index
    %c0_24 = arith.constant 0 : index
    %15 = vector.load %arg2[%c0_20, %c0_21, %c2, %c0_22, %c0_23, %c0_24] : memref<1x1x12x5x5x4xbf16, #tpu.memory_space<vmem>>, vector<1x1x1x5x5x4xbf16>
    %16 = vector.shape_cast %15 : vector<1x1x1x5x5x4xbf16> to vector<5x5x4xbf16>
    %17 = vector.extract_strided_slice %16 {offsets = [0, 0, 0], sizes = [4, 4, 4], strides = [1, 1, 1]} : vector<5x5x4xbf16> to vector<4x4x4xbf16>
    %18 = vector.shape_cast %17 : vector<4x4x4xbf16> to vector<16x4xbf16>
    %c0_25 = arith.constant 0 : index
    %c12 = arith.constant 12 : index
    %19 = vector.load %arg6[%c0_25, %c12] : memref<16x108xbf16, #tpu.memory_space<vmem>>, vector<16x4xbf16>
    tpu.vector_store %arg6[%c0_25, %c12], %18 {strides = array<i32>} : memref<16x108xbf16, #tpu.memory_space<vmem>>, vector<16x4xbf16>,
    %c0_26 = arith.constant 0 : index
    %c0_27 = arith.constant 0 : index
    %c3 = arith.constant 3 : index
    %c0_28 = arith.constant 0 : index
    %c0_29 = arith.constant 0 : index
    %c0_30 = arith.constant 0 : index
    %20 = vector.load %arg2[%c0_26, %c0_27, %c3, %c0_28, %c0_29, %c0_30] : memref<1x1x12x5x5x4xbf16, #tpu.memory_space<vmem>>, vector<1x1x1x5x5x4xbf16>
    %21 = vector.shape_cast %20 : vector<1x1x1x5x5x4xbf16> to vector<5x5x4xbf16>
    %22 = vector.extract_strided_slice %21 {offsets = [0, 0, 0], sizes = [4, 4, 4], strides = [1, 1, 1]} : vector<5x5x4xbf16> to vector<4x4x4xbf16>
    %23 = vector.shape_cast %22 : vector<4x4x4xbf16> to vector<16x4xbf16>
    %c0_31 = arith.constant 0 : index
    %c16 = arith.constant 16 : index
    %24 = vector.load %arg6[%c0_31, %c16] : memref<16x108xbf16, #tpu.memory_space<vmem>>, vector<16x4xbf16>
    tpu.vector_store %arg6[%c0_31, %c16], %23 {strides = array<i32>} : memref<16x108xbf16, #tpu.memory_space<vmem>>, vector<16x4xbf16>,
    %c0_32 = arith.constant 0 : index
    %c0_33 = arith.constant 0 : index
    %c2_34 = arith.constant 2 : index
    %c0_35 = arith.constant 0 : index
    %c0_36 = arith.constant 0 : index
    %c0_37 = arith.constant 0 : index
    %25 = vector.load %arg2[%c0_32, %c0_33, %c2_34, %c0_35, %c0_36, %c0_37] : memref<1x1x12x5x5x4xbf16, #tpu.memory_space<vmem>>, vector<1x1x1x5x5x4xbf16>
    %26 = vector.shape_cast %25 : vector<1x1x1x5x5x4xbf16> to vector<5x5x4xbf16>
    %27 = vector.extract_strided_slice %26 {offsets = [0, 1, 0], sizes = [4, 4, 4], strides = [1, 1, 1]} : vector<5x5x4xbf16> to vector<4x4x4xbf16>
    %28 = vector.shape_cast %27 : vector<4x4x4xbf16> to vector<16x4xbf16>
    %c0_38 = arith.constant 0 : index
    %c20 = arith.constant 20 : index
    %29 = vector.load %arg6[%c0_38, %c20] : memref<16x108xbf16, #tpu.memory_space<vmem>>, vector<16x4xbf16>
    tpu.vector_store %arg6[%c0_38, %c20], %28 {strides = array<i32>} : memref<16x108xbf16, #tpu.memory_space<vmem>>, vector<16x4xbf16>,
    %c0_39 = arith.constant 0 : index
    %c0_40 = arith.constant 0 : index
    %c0_41 = arith.constant 0 : index
    %c0_42 = arith.constant 0 : index
    %c0_43 = arith.constant 0 : index
    %c0_44 = arith.constant 0 : index
    %30 = vector.load %arg2[%c0_39, %c0_40, %c0_41, %c0_42, %c0_43, %c0_44] : memref<1x1x12x5x5x4xbf16, #tpu.memory_space<vmem>>, vector<1x1x1x5x5x4xbf16>
    %31 = vector.shape_cast %30 : vector<1x1x1x5x5x4xbf16> to vector<5x5x4xbf16>
    %32 = vector.extract_strided_slice %31 {offsets = [1, 0, 0], sizes = [4, 4, 4], strides = [1, 1, 1]} : vector<5x5x4xbf16> to vector<4x4x4xbf16>
    %33 = vector.shape_cast %32 : vector<4x4x4xbf16> to vector<16x4xbf16>
    %c0_45 = arith.constant 0 : index
    %c24 = arith.constant 24 : index
    %34 = vector.load %arg6[%c0_45, %c24] : memref<16x108xbf16, #tpu.memory_space<vmem>>, vector<16x4xbf16>
    tpu.vector_store %arg6[%c0_45, %c24], %33 {strides = array<i32>} : memref<16x108xbf16, #tpu.memory_space<vmem>>, vector<16x4xbf16>,
    %c0_46 = arith.constant 0 : index
    %c0_47 = arith.constant 0 : index
    %c1_48 = arith.constant 1 : index
    %c0_49 = arith.constant 0 : index
    %c0_50 = arith.constant 0 : index
    %c0_51 = arith.constant 0 : index
    %35 = vector.load %arg2[%c0_46, %c0_47, %c1_48, %c0_49, %c0_50, %c0_51] : memref<1x1x12x5x5x4xbf16, #tpu.memory_space<vmem>>, vector<1x1x1x5x5x4xbf16>
    %36 = vector.shape_cast %35 : vector<1x1x1x5x5x4xbf16> to vector<5x5x4xbf16>
    %37 = vector.extract_strided_slice %36 {offsets = [1, 0, 0], sizes = [4, 4, 4], strides = [1, 1, 1]} : vector<5x5x4xbf16> to vector<4x4x4xbf16>
    %38 = vector.shape_cast %37 : vector<4x4x4xbf16> to vector<16x4xbf16>
    %c0_52 = arith.constant 0 : index
    %c28 = arith.constant 28 : index
    %39 = vector.load %arg6[%c0_52, %c28] : memref<16x108xbf16, #tpu.memory_space<vmem>>, vector<16x4xbf16>
    tpu.vector_store %arg6[%c0_52, %c28], %38 {strides = array<i32>} : memref<16x108xbf16, #tpu.memory_space<vmem>>, vector<16x4xbf16>,
    %c0_53 = arith.constant 0 : index
    %c0_54 = arith.constant 0 : index
    %c0_55 = arith.constant 0 : index
    %c0_56 = arith.constant 0 : index
    %c0_57 = arith.constant 0 : index
    %c0_58 = arith.constant 0 : index
    %40 = vector.load %arg2[%c0_53, %c0_54, %c0_55, %c0_56, %c0_57, %c0_58] : memref<1x1x12x5x5x4xbf16, #tpu.memory_space<vmem>>, vector<1x1x1x5x5x4xbf16>
    %41 = vector.shape_cast %40 : vector<1x1x1x5x5x4xbf16> to vector<5x5x4xbf16>
    %42 = vector.extract_strided_slice %41 {offsets = [1, 1, 0], sizes = [4, 4, 4], strides = [1, 1, 1]} : vector<5x5x4xbf16> to vector<4x4x4xbf16>
    %43 = vector.shape_cast %42 : vector<4x4x4xbf16> to vector<16x4xbf16>
    %c0_59 = arith.constant 0 : index
    %c32 = arith.constant 32 : index
    %44 = vector.load %arg6[%c0_59, %c32] : memref<16x108xbf16, #tpu.memory_space<vmem>>, vector<16x4xbf16>
    tpu.vector_store %arg6[%c0_59, %c32], %43 {strides = array<i32>} : memref<16x108xbf16, #tpu.memory_space<vmem>>, vector<16x4xbf16>,
    %c0_60 = arith.constant 0 : index
    %c0_61 = arith.constant 0 : index
    %c4_62 = arith.constant 4 : index
    %c0_63 = arith.constant 0 : index
    %c0_64 = arith.constant 0 : index
    %c0_65 = arith.constant 0 : index
    %45 = vector.load %arg2[%c0_60, %c0_61, %c4_62, %c0_63, %c0_64, %c0_65] : memref<1x1x12x5x5x4xbf16, #tpu.memory_space<vmem>>, vector<1x1x1x5x5x4xbf16>
    %46 = vector.shape_cast %45 : vector<1x1x1x5x5x4xbf16> to vector<5x5x4xbf16>
    %47 = vector.extract_strided_slice %46 {offsets = [0, 0, 0], sizes = [4, 4, 4], strides = [1, 1, 1]} : vector<5x5x4xbf16> to vector<4x4x4xbf16>
    %48 = vector.shape_cast %47 : vector<4x4x4xbf16> to vector<16x4xbf16>
    %c0_66 = arith.constant 0 : index
    %c36 = arith.constant 36 : index
    %49 = vector.load %arg6[%c0_66, %c36] : memref<16x108xbf16, #tpu.memory_space<vmem>>, vector<16x4xbf16>
    tpu.vector_store %arg6[%c0_66, %c36], %48 {strides = array<i32>} : memref<16x108xbf16, #tpu.memory_space<vmem>>, vector<16x4xbf16>,
    %c0_67 = arith.constant 0 : index
    %c0_68 = arith.constant 0 : index
    %c5 = arith.constant 5 : index
    %c0_69 = arith.constant 0 : index
    %c0_70 = arith.constant 0 : index
    %c0_71 = arith.constant 0 : index
    %50 = vector.load %arg2[%c0_67, %c0_68, %c5, %c0_69, %c0_70, %c0_71] : memref<1x1x12x5x5x4xbf16, #tpu.memory_space<vmem>>, vector<1x1x1x5x5x4xbf16>
    %51 = vector.shape_cast %50 : vector<1x1x1x5x5x4xbf16> to vector<5x5x4xbf16>
    %52 = vector.extract_strided_slice %51 {offsets = [0, 0, 0], sizes = [4, 4, 4], strides = [1, 1, 1]} : vector<5x5x4xbf16> to vector<4x4x4xbf16>
    %53 = vector.shape_cast %52 : vector<4x4x4xbf16> to vector<16x4xbf16>
    %c0_72 = arith.constant 0 : index
    %c40 = arith.constant 40 : index
    %54 = vector.load %arg6[%c0_72, %c40] : memref<16x108xbf16, #tpu.memory_space<vmem>>, vector<16x4xbf16>
    tpu.vector_store %arg6[%c0_72, %c40], %53 {strides = array<i32>} : memref<16x108xbf16, #tpu.memory_space<vmem>>, vector<16x4xbf16>,
    %c0_73 = arith.constant 0 : index
    %c0_74 = arith.constant 0 : index
    %c4_75 = arith.constant 4 : index
    %c0_76 = arith.constant 0 : index
    %c0_77 = arith.constant 0 : index
    %c0_78 = arith.constant 0 : index
    %55 = vector.load %arg2[%c0_73, %c0_74, %c4_75, %c0_76, %c0_77, %c0_78] : memref<1x1x12x5x5x4xbf16, #tpu.memory_space<vmem>>, vector<1x1x1x5x5x4xbf16>
    %56 = vector.shape_cast %55 : vector<1x1x1x5x5x4xbf16> to vector<5x5x4xbf16>
    %57 = vector.extract_strided_slice %56 {offsets = [0, 1, 0], sizes = [4, 4, 4], strides = [1, 1, 1]} : vector<5x5x4xbf16> to vector<4x4x4xbf16>
    %58 = vector.shape_cast %57 : vector<4x4x4xbf16> to vector<16x4xbf16>
    %c0_79 = arith.constant 0 : index
    %c44 = arith.constant 44 : index
    %59 = vector.load %arg6[%c0_79, %c44] : memref<16x108xbf16, #tpu.memory_space<vmem>>, vector<16x4xbf16>
    tpu.vector_store %arg6[%c0_79, %c44], %58 {strides = array<i32>} : memref<16x108xbf16, #tpu.memory_space<vmem>>, vector<16x4xbf16>,
    %c0_80 = arith.constant 0 : index
    %c0_81 = arith.constant 0 : index
    %c6 = arith.constant 6 : index
    %c0_82 = arith.constant 0 : index
    %c0_83 = arith.constant 0 : index
    %c0_84 = arith.constant 0 : index
    %60 = vector.load %arg2[%c0_80, %c0_81, %c6, %c0_82, %c0_83, %c0_84] : memref<1x1x12x5x5x4xbf16, #tpu.memory_space<vmem>>, vector<1x1x1x5x5x4xbf16>
    %61 = vector.shape_cast %60 : vector<1x1x1x5x5x4xbf16> to vector<5x5x4xbf16>
    %62 = vector.extract_strided_slice %61 {offsets = [0, 0, 0], sizes = [4, 4, 4], strides = [1, 1, 1]} : vector<5x5x4xbf16> to vector<4x4x4xbf16>
    %63 = vector.shape_cast %62 : vector<4x4x4xbf16> to vector<16x4xbf16>
    %c0_85 = arith.constant 0 : index
    %c48 = arith.constant 48 : index
    %64 = vector.load %arg6[%c0_85, %c48] : memref<16x108xbf16, #tpu.memory_space<vmem>>, vector<16x4xbf16>
    tpu.vector_store %arg6[%c0_85, %c48], %63 {strides = array<i32>} : memref<16x108xbf16, #tpu.memory_space<vmem>>, vector<16x4xbf16>,
    %c0_86 = arith.constant 0 : index
    %c0_87 = arith.constant 0 : index
    %c7 = arith.constant 7 : index
    %c0_88 = arith.constant 0 : index
    %c0_89 = arith.constant 0 : index
    %c0_90 = arith.constant 0 : index
    %65 = vector.load %arg2[%c0_86, %c0_87, %c7, %c0_88, %c0_89, %c0_90] : memref<1x1x12x5x5x4xbf16, #tpu.memory_space<vmem>>, vector<1x1x1x5x5x4xbf16>
    %66 = vector.shape_cast %65 : vector<1x1x1x5x5x4xbf16> to vector<5x5x4xbf16>
    %67 = vector.extract_strided_slice %66 {offsets = [0, 0, 0], sizes = [4, 4, 4], strides = [1, 1, 1]} : vector<5x5x4xbf16> to vector<4x4x4xbf16>
    %68 = vector.shape_cast %67 : vector<4x4x4xbf16> to vector<16x4xbf16>
    %c0_91 = arith.constant 0 : index
    %c52 = arith.constant 52 : index
    %69 = vector.load %arg6[%c0_91, %c52] : memref<16x108xbf16, #tpu.memory_space<vmem>>, vector<16x4xbf16>
    tpu.vector_store %arg6[%c0_91, %c52], %68 {strides = array<i32>} : memref<16x108xbf16, #tpu.memory_space<vmem>>, vector<16x4xbf16>,
    %c0_92 = arith.constant 0 : index
    %c0_93 = arith.constant 0 : index
    %c6_94 = arith.constant 6 : index
    %c0_95 = arith.constant 0 : index
    %c0_96 = arith.constant 0 : index
    %c0_97 = arith.constant 0 : index
    %70 = vector.load %arg2[%c0_92, %c0_93, %c6_94, %c0_95, %c0_96, %c0_97] : memref<1x1x12x5x5x4xbf16, #tpu.memory_space<vmem>>, vector<1x1x1x5x5x4xbf16>
    %71 = vector.shape_cast %70 : vector<1x1x1x5x5x4xbf16> to vector<5x5x4xbf16>
    %72 = vector.extract_strided_slice %71 {offsets = [0, 1, 0], sizes = [4, 4, 4], strides = [1, 1, 1]} : vector<5x5x4xbf16> to vector<4x4x4xbf16>
    %73 = vector.shape_cast %72 : vector<4x4x4xbf16> to vector<16x4xbf16>
    %c0_98 = arith.constant 0 : index
    %c56 = arith.constant 56 : index
    %74 = vector.load %arg6[%c0_98, %c56] : memref<16x108xbf16, #tpu.memory_space<vmem>>, vector<16x4xbf16>
    tpu.vector_store %arg6[%c0_98, %c56], %73 {strides = array<i32>} : memref<16x108xbf16, #tpu.memory_space<vmem>>, vector<16x4xbf16>,
    %c0_99 = arith.constant 0 : index
    %c0_100 = arith.constant 0 : index
    %c4_101 = arith.constant 4 : index
    %c0_102 = arith.constant 0 : index
    %c0_103 = arith.constant 0 : index
    %c0_104 = arith.constant 0 : index
    %75 = vector.load %arg2[%c0_99, %c0_100, %c4_101, %c0_102, %c0_103, %c0_104] : memref<1x1x12x5x5x4xbf16, #tpu.memory_space<vmem>>, vector<1x1x1x5x5x4xbf16>
    %76 = vector.shape_cast %75 : vector<1x1x1x5x5x4xbf16> to vector<5x5x4xbf16>
    %77 = vector.extract_strided_slice %76 {offsets = [1, 0, 0], sizes = [4, 4, 4], strides = [1, 1, 1]} : vector<5x5x4xbf16> to vector<4x4x4xbf16>
    %78 = vector.shape_cast %77 : vector<4x4x4xbf16> to vector<16x4xbf16>
    %c0_105 = arith.constant 0 : index
    %c60 = arith.constant 60 : index
    %79 = vector.load %arg6[%c0_105, %c60] : memref<16x108xbf16, #tpu.memory_space<vmem>>, vector<16x4xbf16>
    tpu.vector_store %arg6[%c0_105, %c60], %78 {strides = array<i32>} : memref<16x108xbf16, #tpu.memory_space<vmem>>, vector<16x4xbf16>,
    %c0_106 = arith.constant 0 : index
    %c0_107 = arith.constant 0 : index
    %c5_108 = arith.constant 5 : index
    %c0_109 = arith.constant 0 : index
    %c0_110 = arith.constant 0 : index
    %c0_111 = arith.constant 0 : index
    %80 = vector.load %arg2[%c0_106, %c0_107, %c5_108, %c0_109, %c0_110, %c0_111] : memref<1x1x12x5x5x4xbf16, #tpu.memory_space<vmem>>, vector<1x1x1x5x5x4xbf16>
    %81 = vector.shape_cast %80 : vector<1x1x1x5x5x4xbf16> to vector<5x5x4xbf16>
    %82 = vector.extract_strided_slice %81 {offsets = [1, 0, 0], sizes = [4, 4, 4], strides = [1, 1, 1]} : vector<5x5x4xbf16> to vector<4x4x4xbf16>
    %83 = vector.shape_cast %82 : vector<4x4x4xbf16> to vector<16x4xbf16>
    %c0_112 = arith.constant 0 : index
    %c64 = arith.constant 64 : index
    %84 = vector.load %arg6[%c0_112, %c64] : memref<16x108xbf16, #tpu.memory_space<vmem>>, vector<16x4xbf16>
    tpu.vector_store %arg6[%c0_112, %c64], %83 {strides = array<i32>} : memref<16x108xbf16, #tpu.memory_space<vmem>>, vector<16x4xbf16>,
    %c0_113 = arith.constant 0 : index
    %c0_114 = arith.constant 0 : index
    %c4_115 = arith.constant 4 : index
    %c0_116 = arith.constant 0 : index
    %c0_117 = arith.constant 0 : index
    %c0_118 = arith.constant 0 : index
    %85 = vector.load %arg2[%c0_113, %c0_114, %c4_115, %c0_116, %c0_117, %c0_118] : memref<1x1x12x5x5x4xbf16, #tpu.memory_space<vmem>>, vector<1x1x1x5x5x4xbf16>
    %86 = vector.shape_cast %85 : vector<1x1x1x5x5x4xbf16> to vector<5x5x4xbf16>
    %87 = vector.extract_strided_slice %86 {offsets = [1, 1, 0], sizes = [4, 4, 4], strides = [1, 1, 1]} : vector<5x5x4xbf16> to vector<4x4x4xbf16>
    %88 = vector.shape_cast %87 : vector<4x4x4xbf16> to vector<16x4xbf16>
    %c0_119 = arith.constant 0 : index
    %c68 = arith.constant 68 : index
    %89 = vector.load %arg6[%c0_119, %c68] : memref<16x108xbf16, #tpu.memory_space<vmem>>, vector<16x4xbf16>
    tpu.vector_store %arg6[%c0_119, %c68], %88 {strides = array<i32>} : memref<16x108xbf16, #tpu.memory_space<vmem>>, vector<16x4xbf16>,
    %c0_120 = arith.constant 0 : index
    %c0_121 = arith.constant 0 : index
    %c8_122 = arith.constant 8 : index
    %c0_123 = arith.constant 0 : index
    %c0_124 = arith.constant 0 : index
    %c0_125 = arith.constant 0 : index
    %90 = vector.load %arg2[%c0_120, %c0_121, %c8_122, %c0_123, %c0_124, %c0_125] : memref<1x1x12x5x5x4xbf16, #tpu.memory_space<vmem>>, vector<1x1x1x5x5x4xbf16>
    %91 = vector.shape_cast %90 : vector<1x1x1x5x5x4xbf16> to vector<5x5x4xbf16>
    %92 = vector.extract_strided_slice %91 {offsets = [0, 0, 0], sizes = [4, 4, 4], strides = [1, 1, 1]} : vector<5x5x4xbf16> to vector<4x4x4xbf16>
    %93 = vector.shape_cast %92 : vector<4x4x4xbf16> to vector<16x4xbf16>
    %c0_126 = arith.constant 0 : index
    %c72 = arith.constant 72 : index
    %94 = vector.load %arg6[%c0_126, %c72] : memref<16x108xbf16, #tpu.memory_space<vmem>>, vector<16x4xbf16>
    tpu.vector_store %arg6[%c0_126, %c72], %93 {strides = array<i32>} : memref<16x108xbf16, #tpu.memory_space<vmem>>, vector<16x4xbf16>,
    %c0_127 = arith.constant 0 : index
    %c0_128 = arith.constant 0 : index
    %c9 = arith.constant 9 : index
    %c0_129 = arith.constant 0 : index
    %c0_130 = arith.constant 0 : index
    %c0_131 = arith.constant 0 : index
    %95 = vector.load %arg2[%c0_127, %c0_128, %c9, %c0_129, %c0_130, %c0_131] : memref<1x1x12x5x5x4xbf16, #tpu.memory_space<vmem>>, vector<1x1x1x5x5x4xbf16>
    %96 = vector.shape_cast %95 : vector<1x1x1x5x5x4xbf16> to vector<5x5x4xbf16>
    %97 = vector.extract_strided_slice %96 {offsets = [0, 0, 0], sizes = [4, 4, 4], strides = [1, 1, 1]} : vector<5x5x4xbf16> to vector<4x4x4xbf16>
    %98 = vector.shape_cast %97 : vector<4x4x4xbf16> to vector<16x4xbf16>
    %c0_132 = arith.constant 0 : index
    %c76 = arith.constant 76 : index
    %99 = vector.load %arg6[%c0_132, %c76] : memref<16x108xbf16, #tpu.memory_space<vmem>>, vector<16x4xbf16>
    tpu.vector_store %arg6[%c0_132, %c76], %98 {strides = array<i32>} : memref<16x108xbf16, #tpu.memory_space<vmem>>, vector<16x4xbf16>,
    %c0_133 = arith.constant 0 : index
    %c0_134 = arith.constant 0 : index
    %c8_135 = arith.constant 8 : index
    %c0_136 = arith.constant 0 : index
    %c0_137 = arith.constant 0 : index
    %c0_138 = arith.constant 0 : index
    %100 = vector.load %arg2[%c0_133, %c0_134, %c8_135, %c0_136, %c0_137, %c0_138] : memref<1x1x12x5x5x4xbf16, #tpu.memory_space<vmem>>, vector<1x1x1x5x5x4xbf16>
    %101 = vector.shape_cast %100 : vector<1x1x1x5x5x4xbf16> to vector<5x5x4xbf16>
    %102 = vector.extract_strided_slice %101 {offsets = [0, 1, 0], sizes = [4, 4, 4], strides = [1, 1, 1]} : vector<5x5x4xbf16> to vector<4x4x4xbf16>
    %103 = vector.shape_cast %102 : vector<4x4x4xbf16> to vector<16x4xbf16>
    %c0_139 = arith.constant 0 : index
    %c80 = arith.constant 80 : index
    %104 = vector.load %arg6[%c0_139, %c80] : memref<16x108xbf16, #tpu.memory_space<vmem>>, vector<16x4xbf16>
    tpu.vector_store %arg6[%c0_139, %c80], %103 {strides = array<i32>} : memref<16x108xbf16, #tpu.memory_space<vmem>>, vector<16x4xbf16>,
    %c0_140 = arith.constant 0 : index
    %c0_141 = arith.constant 0 : index
    %c10 = arith.constant 10 : index
    %c0_142 = arith.constant 0 : index
    %c0_143 = arith.constant 0 : index
    %c0_144 = arith.constant 0 : index
    %105 = vector.load %arg2[%c0_140, %c0_141, %c10, %c0_142, %c0_143, %c0_144] : memref<1x1x12x5x5x4xbf16, #tpu.memory_space<vmem>>, vector<1x1x1x5x5x4xbf16>
    %106 = vector.shape_cast %105 : vector<1x1x1x5x5x4xbf16> to vector<5x5x4xbf16>
    %107 = vector.extract_strided_slice %106 {offsets = [0, 0, 0], sizes = [4, 4, 4], strides = [1, 1, 1]} : vector<5x5x4xbf16> to vector<4x4x4xbf16>
    %108 = vector.shape_cast %107 : vector<4x4x4xbf16> to vector<16x4xbf16>
    %c0_145 = arith.constant 0 : index
    %c84 = arith.constant 84 : index
    %109 = vector.load %arg6[%c0_145, %c84] : memref<16x108xbf16, #tpu.memory_space<vmem>>, vector<16x4xbf16>
    tpu.vector_store %arg6[%c0_145, %c84], %108 {strides = array<i32>} : memref<16x108xbf16, #tpu.memory_space<vmem>>, vector<16x4xbf16>,
    %c0_146 = arith.constant 0 : index
    %c0_147 = arith.constant 0 : index
    %c11 = arith.constant 11 : index
    %c0_148 = arith.constant 0 : index
    %c0_149 = arith.constant 0 : index
    %c0_150 = arith.constant 0 : index
    %110 = vector.load %arg2[%c0_146, %c0_147, %c11, %c0_148, %c0_149, %c0_150] : memref<1x1x12x5x5x4xbf16, #tpu.memory_space<vmem>>, vector<1x1x1x5x5x4xbf16>
    %111 = vector.shape_cast %110 : vector<1x1x1x5x5x4xbf16> to vector<5x5x4xbf16>
    %112 = vector.extract_strided_slice %111 {offsets = [0, 0, 0], sizes = [4, 4, 4], strides = [1, 1, 1]} : vector<5x5x4xbf16> to vector<4x4x4xbf16>
    %113 = vector.shape_cast %112 : vector<4x4x4xbf16> to vector<16x4xbf16>
    %c0_151 = arith.constant 0 : index
    %c88 = arith.constant 88 : index
    %114 = vector.load %arg6[%c0_151, %c88] : memref<16x108xbf16, #tpu.memory_space<vmem>>, vector<16x4xbf16>
    tpu.vector_store %arg6[%c0_151, %c88], %113 {strides = array<i32>} : memref<16x108xbf16, #tpu.memory_space<vmem>>, vector<16x4xbf16>,
    %c0_152 = arith.constant 0 : index
    %c0_153 = arith.constant 0 : index
    %c10_154 = arith.constant 10 : index
    %c0_155 = arith.constant 0 : index
    %c0_156 = arith.constant 0 : index
    %c0_157 = arith.constant 0 : index
    %115 = vector.load %arg2[%c0_152, %c0_153, %c10_154, %c0_155, %c0_156, %c0_157] : memref<1x1x12x5x5x4xbf16, #tpu.memory_space<vmem>>, vector<1x1x1x5x5x4xbf16>
    %116 = vector.shape_cast %115 : vector<1x1x1x5x5x4xbf16> to vector<5x5x4xbf16>
    %117 = vector.extract_strided_slice %116 {offsets = [0, 1, 0], sizes = [4, 4, 4], strides = [1, 1, 1]} : vector<5x5x4xbf16> to vector<4x4x4xbf16>
    %118 = vector.shape_cast %117 : vector<4x4x4xbf16> to vector<16x4xbf16>
    %c0_158 = arith.constant 0 : index
    %c92 = arith.constant 92 : index
    %119 = vector.load %arg6[%c0_158, %c92] : memref<16x108xbf16, #tpu.memory_space<vmem>>, vector<16x4xbf16>
    tpu.vector_store %arg6[%c0_158, %c92], %118 {strides = array<i32>} : memref<16x108xbf16, #tpu.memory_space<vmem>>, vector<16x4xbf16>,
    %c0_159 = arith.constant 0 : index
    %c0_160 = arith.constant 0 : index
    %c8_161 = arith.constant 8 : index
    %c0_162 = arith.constant 0 : index
    %c0_163 = arith.constant 0 : index
    %c0_164 = arith.constant 0 : index
    %120 = vector.load %arg2[%c0_159, %c0_160, %c8_161, %c0_162, %c0_163, %c0_164] : memref<1x1x12x5x5x4xbf16, #tpu.memory_space<vmem>>, vector<1x1x1x5x5x4xbf16>
    %121 = vector.shape_cast %120 : vector<1x1x1x5x5x4xbf16> to vector<5x5x4xbf16>
    %122 = vector.extract_strided_slice %121 {offsets = [1, 0, 0], sizes = [4, 4, 4], strides = [1, 1, 1]} : vector<5x5x4xbf16> to vector<4x4x4xbf16>
    %123 = vector.shape_cast %122 : vector<4x4x4xbf16> to vector<16x4xbf16>
    %c0_165 = arith.constant 0 : index
    %c96 = arith.constant 96 : index
    %124 = vector.load %arg6[%c0_165, %c96] : memref<16x108xbf16, #tpu.memory_space<vmem>>, vector<16x4xbf16>
    tpu.vector_store %arg6[%c0_165, %c96], %123 {strides = array<i32>} : memref<16x108xbf16, #tpu.memory_space<vmem>>, vector<16x4xbf16>,
    %c0_166 = arith.constant 0 : index
    %c0_167 = arith.constant 0 : index
    %c9_168 = arith.constant 9 : index
    %c0_169 = arith.constant 0 : index
    %c0_170 = arith.constant 0 : index
    %c0_171 = arith.constant 0 : index
    %125 = vector.load %arg2[%c0_166, %c0_167, %c9_168, %c0_169, %c0_170, %c0_171] : memref<1x1x12x5x5x4xbf16, #tpu.memory_space<vmem>>, vector<1x1x1x5x5x4xbf16>
    %126 = vector.shape_cast %125 : vector<1x1x1x5x5x4xbf16> to vector<5x5x4xbf16>
    %127 = vector.extract_strided_slice %126 {offsets = [1, 0, 0], sizes = [4, 4, 4], strides = [1, 1, 1]} : vector<5x5x4xbf16> to vector<4x4x4xbf16>
    %128 = vector.shape_cast %127 : vector<4x4x4xbf16> to vector<16x4xbf16>
    %c0_172 = arith.constant 0 : index
    %c100 = arith.constant 100 : index
    %129 = vector.load %arg6[%c0_172, %c100] : memref<16x108xbf16, #tpu.memory_space<vmem>>, vector<16x4xbf16>
    tpu.vector_store %arg6[%c0_172, %c100], %128 {strides = array<i32>} : memref<16x108xbf16, #tpu.memory_space<vmem>>, vector<16x4xbf16>,
    %c0_173 = arith.constant 0 : index
    %c0_174 = arith.constant 0 : index
    %c8_175 = arith.constant 8 : index
    %c0_176 = arith.constant 0 : index
    %c0_177 = arith.constant 0 : index
    %c0_178 = arith.constant 0 : index
    %130 = vector.load %arg2[%c0_173, %c0_174, %c8_175, %c0_176, %c0_177, %c0_178] : memref<1x1x12x5x5x4xbf16, #tpu.memory_space<vmem>>, vector<1x1x1x5x5x4xbf16>
    %131 = vector.shape_cast %130 : vector<1x1x1x5x5x4xbf16> to vector<5x5x4xbf16>
    %132 = vector.extract_strided_slice %131 {offsets = [1, 1, 0], sizes = [4, 4, 4], strides = [1, 1, 1]} : vector<5x5x4xbf16> to vector<4x4x4xbf16>
    %133 = vector.shape_cast %132 : vector<4x4x4xbf16> to vector<16x4xbf16>
    %c0_179 = arith.constant 0 : index
    %c104 = arith.constant 104 : index
    %134 = vector.load %arg6[%c0_179, %c104] : memref<16x108xbf16, #tpu.memory_space<vmem>>, vector<16x4xbf16>
    tpu.vector_store %arg6[%c0_179, %c104], %133 {strides = array<i32>} : memref<16x108xbf16, #tpu.memory_space<vmem>>, vector<16x4xbf16>,
    %c0_180 = arith.constant 0 : index
    %c0_181 = arith.constant 0 : index
    %135 = vector.load %arg6[%c0_180, %c0_181] : memref<16x108xbf16, #tpu.memory_space<vmem>>, vector<16x108xbf16>
    %c0_182 = arith.constant 0 : index
    %c0_183 = arith.constant 0 : index
    %136 = vector.load %arg3[%c0_182, %c0_183] : memref<108x128xbf16, #tpu.memory_space<vmem>>, vector<108x128xbf16>
    %cst = arith.constant dense<0.000000e+00> : vector<16x128xf32>
    %137 = tpu.matmul %135, %136, %cst {dimension_numbers = #tpu.dot_dimension_numbers<[1], [0], [0], [1], [0, 0, 1, 1], [], []>} : vector<16x108xbf16>, vector<108x128xbf16>, vector<16x128xf32> -> vector<16x128xf32>
    %c0_184 = arith.constant 0 : index
    %c0_185 = arith.constant 0 : index
    %138 = vector.load %arg4[%c0_184, %c0_185] : memref<1x128xf32, #tpu.memory_space<vmem>>, vector<1x128xf32>
    %139 = vector.broadcast %138 : vector<1x128xf32> to vector<16x128xf32>
    %140 = arith.addf %137, %139 : vector<16x128xf32>
    %141 = vector.shape_cast %140 : vector<16x128xf32> to vector<1x1x16x128xf32>
    %c0_186 = arith.constant 0 : index
    %c0_187 = arith.constant 0 : index
    %c0_188 = arith.constant 0 : index
    %c0_189 = arith.constant 0 : index
    %142 = vector.load %arg5[%c0_186, %c0_187, %c0_188, %c0_189] : memref<1x1x16x128xf32, #tpu.memory_space<vmem>>, vector<1x1x16x128xf32>
    tpu.vector_store %arg5[%c0_186, %c0_187, %c0_188, %c0_189], %141 {strides = array<i32>} : memref<1x1x16x128xf32, #tpu.memory_space<vmem>>, vector<1x1x16x128xf32>,
    return
  }
  func.func @transform_0(%arg0: i32, %arg1: i32) -> (i32, i32, i32, i32, i32, i32) {
    %c0_i32 = arith.constant 0 : i32
    %c0_i32_0 = arith.constant 0 : i32
    %c0_i32_1 = arith.constant 0 : i32
    %c0_i32_2 = arith.constant 0 : i32
    %c0_i32_3 = arith.constant 0 : i32
    return %arg0, %arg1, %c0_i32, %c0_i32_0, %c0_i32_1, %c0_i32_2 : i32, i32, i32, i32, i32, i32
  }
  func.func @transform_1(%arg0: i32, %arg1: i32) -> (i32, i32) {
    %c0_i32 = arith.constant 0 : i32
    %c0_i32_0 = arith.constant 0 : i32
    %c0_i32_1 = arith.constant 0 : i32
    return %c0_i32, %c0_i32_0 : i32, i32
  }
  func.func @transform_2(%arg0: i32, %arg1: i32) -> (i32, i32) {
    %c0_i32 = arith.constant 0 : i32
    %c0_i32_0 = arith.constant 0 : i32
    %c0_i32_1 = arith.constant 0 : i32
    return %c0_i32, %c0_i32_0 : i32, i32
  }
  func.func @transform_3(%arg0: i32, %arg1: i32) -> (i32, i32, i32, i32) {
    %c0_i32 = arith.constant 0 : i32
    %c0_i32_0 = arith.constant 0 : i32
    %c0_i32_1 = arith.constant 0 : i32
    return %arg0, %arg1, %c0_i32, %c0_i32_0 : i32, i32, i32, i32
  }
}

</mosaic_0001>

<bundles_post_ra>
// kernel: downsample_forward.1
= control target key start
LH: loop header
LB: loop body
LE: loop exit
PB: predicated region body
PF: predicated region fallthrough
CT: control target
= control target key end

     0   :  { %s2535_s12 = smov 0   ;;  %s2537_s13 = smov 0   ;;  %s2815_s0 = inlined_call_operand.vmem [shape: bf16[2,4,12,5,5,4], index: 0, kind: input, shape index: {}]   ;;  %s2816_s1 = inlined_call_operand.vmem [shape: bf16[108,128], index: 1, kind: input, shape index: {}]   ;;  %s2817_s2 = inlined_call_operand.vmem [shape: f32[1,128], index: 2, kind: input, shape index: {}]   ;;  %s2818_s3 = inlined_call_operand.vmem [shape: f32[2,4,16,128], index: 3, kind: output, shape index: {}]  }
   0x1   :  { %s2539_s14 = smov 0   ;;  %s2541_s15 = smov 0  }
   0x2   :  { %s2543_s16 = smov 0  }
   0x3 LB: > { %s22_s17 = sadd.s32 1, %s2476_s14  ;;  %s25_s18 = sadd.s32 1, %s2480_s15  ;;  %s2484_s16 = sphi %s2543_s16, %s13_s16   ;;  %s2480_s15 = sphi %s2541_s15, %s2824_s15   ;;  %s2476_s14 = sphi %s2539_s14, %s2823_s14   ;;  %s2472_s13 = sphi %s2537_s13, %s2822_s13   ;;  %s2468_s12 = sphi %s2535_s12, %s2821_s12  }
   0x4   : > { %p23_p0 = scmp.ge.s32.totalorder %s22_s17, 4  ;;  %p2124_p1 = scmp.ge.s32.totalorder %s2484_s16, 1 }
   0x5   : > { %p157_p2 = scmp.lt.s32.totalorder %s2484_s16, 9 }
   0x6   : > { %s2826_s17 = smov (%p23_p0, %s22_s17), 0  ;;  %s2828_s18 = smov (!%p23_p0, %s25_s18), %s2480_s15 }
   0x7   : > { %p158_p3 = pnand %p2124_p1, %p157_p2  ;;  %p27_p4 = scmp.ge.s32.totalorder %s2828_s18, 2 }
   0x8   : > { %p189_p5 = scmp.lt.s32.totalorder (!%p158_p3), %s2472_s13, 1  ;;  %p191_p6 = scmp.lt.s32.totalorder (!%p158_p3), %s2468_s12, 3 }
   0x9   : > { %s2830_s18 = smov (%p27_p4, %s2828_s18), 0  ;;  %161 = sbr.rel (%p158_p3) target bundleno = 462 (0x1ce), region = 32 }
   0xa   : > { %s2487_s26 = smov (!%p158_p3), 12   ;;  %s2488_s27 = smov (!%p158_p3), 4  }
   0xb   : > { %s2489_s28 = smov (!%p158_p3), 16   ;;  %s2490_s29 = smov (!%p158_p3), 24  }
   0xc   : > { %s2491_s30 = smov (!%p158_p3), 8   ;;  %s2492_s4 = smov (!%p158_p3), 20  }
   0xd   : > { %s2493_s5 = smov (!%p158_p3), 28   ;;  %s2494_s6 = smov (!%p158_p3), 32  }
   0xe   : > { %v220_v0 = vlaneseq  ;;  %v2486_v1 = vmov 1983009808   ;;  %s2832_s13 = smov (!%p189_p5, %s2472_s13), 1  ;;  %s2834_s12 = smov (!%p191_p6, %s2468_s12), 3  ;;  %vm311_vm0 = vsmask.f32 1280 }
   0xf   : > { %v218_v2 = vunpack.c.l.s4 %v2486_v1  ;;  %s2296_s19 = smul.u32 240, %s2832_s13  ;;  %vm312_vm1 = vsmask.f32 3336  ;;  %vm314_vm2 = vsmask.f32 5392  ;;  %s2495_s7 = smov 36  }
  0x10   : > { %v221_v4 = vshrl.u32 %v220_v0, 7  ;;  %s2295_s20 = smul.u32 60, %s2834_s12  ;;  %vm316_vm3 = vsmask.f32 7448  ;;  %vm313_vm4 = vmor %vm311_vm0, %vm312_vm1  ;;  %s2496_s8 = smov 40   ;;  %vm234_vm7 = vcmask 27648  }
  0x11   : > { %v219_v3 = vunpack.c.0.s8 %v218_v2  ;;  %vm315_vm5 = vmor %vm313_vm4, %vm314_vm2  ;;  %s2497_s9 = smov 44   ;;  %s2498_s10 = smov 48   ;;  %vm1978_vm8 = vcmask 1045504   ;;  %vm2512_vm9 = vmmov 0   ;;  %v2405_v30 = vld [vmem:[%s2816_s1 + $0x18] sm:$0xff]   ;;  %vm268_vm10 = vcmask 60448  }
  0x12   : > { %s195_s21 = sadd.s32 %s2296_s19, %s2295_s20  ;;  %vm2595_vm6 = vmor %vm315_vm5, %vm316_vm3  ;;  %s2499_s11 = smov 52   ;;  %vm396_vm11 = vcmask 93248   ;;  %vm430_vm12 = vcmask 126048   ;;  %vm464_vm13 = vcmask 158848   ;;  %vm585_vm14 = vcmask 191648  }
  0x13   : > { %s2125_s22 = sshll.u32 %s195_s21, 2  ;;  %v2571_v5 = vsub.s32 %v219_v3, %v221_v4  ;;  %s2500_s19 = smov 56   ;;  %vm618_vm15 = vcmask 224448   ;;  %vm651_vm0 = vcmask 257248   ;;  %vm772_vm1 = vcmask 290048  }
  0x14   : > { %s2576_s25 = scalar_lea.vmem %s2815_s0, %s2125_s22  ;;  %s2501_s20 = smov 60   ;;  %vm806_vm2 = vcmask 322848   ;;  %vm840_vm3 = vcmask 355648   ;;  %vm961_vm4 = vcmask 388448   ;;  %vm995_vm5 = vcmask 421248  }
  0x15   : > { %v2410_v6 = vld.sshfl [vmem:[%s2576_s25 + $0x30] sm:$0x5f pattern:$0x76325410]  ;;  %s2502_s21 = smov 64   ;;  %s2503_s22 = smov 68  }
  0x16   : > { %v2411_v7 = vld.sshfl [vmem:[%s2576_s25 + $0x14] sm:$0x5f pattern:$0x76325410]  ;;  %426 = vrot.lane.b32.xlu1 %v2410_v6, %s2487_s26  ;;  %s2504_s23 = smov 72   ;;  %s2505_s24 = smov 76  }
  0x17   : > { %v2412_v8 = vld.sshfl [vmem:[%s2576_s25 + $0x44] sm:$0x5f pattern:$0x76325410]  ;;  %262 = vrot.lane.b32.xlu0 %v2411_v7, %s2488_s27 }
  0x18   : > { %v2413_v9 = vld.sshfl [vmem:[%s2576_s25 + $0x1c] sm:$0x5f pattern:$0x76325410] }
  0x19   : > { %v2414_v10 = vld.sshfl [vmem:[%s2576_s25 + $0xc] sm:$0x5f pattern:$0x76325410] }
  0x1a   : > { %v2415_v11 = vld.sshfl [vmem:[%s2576_s25 + $0x28] sm:$0x5f pattern:$0x76325410]  ;;  %460 = vrot.lane.b32.xlu1 %v2412_v8, %s2489_s28 }
  0x1b   : > { %v2133_v12 = vld.sshfl [vmem:[%s2576_s25] sm:$0x13 pattern:$0x76325410]  ;;  %264 = vrot.lane.b32.xlu0 %v2413_v9, %s2488_s27  ;;  %s2507_s27 = smov 84  }
  0x1c   : > { %v2134_v13 = vld.sshfl [vmem:[%s2576_s25 + $0x4] sm:$0x13 pattern:$0x76325410]  ;;  %v286_v14 = vcombine.high %v2133_v12, %v2133_v12  ;;  %v319_v15 = vshrl.u32 %v2133_v12, 16  ;;  %v322_v16 = vshll.u32 %v2133_v12, 16 }
  0x1d   : > { %v294_v17 = vcombine.high %v2134_v13, %v2134_v13  ;;  %v333_v18 = vshrl.u32 %v2134_v13, 16  ;;  %v336_v19 = vshll.u32 %v2134_v13, 16  ;;  %v2416_v20 = vld.sshfl [vmem:[%s2576_s25 + $0x3c] sm:$0x5f pattern:$0x76325410] }
  0x1e   : > { %v321_v21 = vrot.slane %v319_v15, 6  ;;  %v324_v22 = vrot.slane %v322_v16, 7  ;;  %v328_v23 = vshll.u32 %v286_v14, 16  ;;  %614 = vrot.lane.b32.xlu1 %v2414_v10, %s2490_s29 }
  0x1f   : > { %v335_v24 = vrot.slane %v333_v18, 6  ;;  %v338_v25 = vrot.slane %v336_v19, 7  ;;  %v342_v26 = vshll.u32 %v294_v17, 16  ;;  %424 = vrot.lane.b32.xlu0 %v2415_v11, %s2487_s26  ;;  %s2506_s26 = smov 80  }
  0x20   : > { %v325_v27 = vor.u32 %v324_v22, %v321_v21  ;;  %v330_v28 = vrot.slane %v328_v23, 7  ;;  %v2135_v29 = vld.sshfl [vmem:[%s2576_s25 + $0x8] sm:$0x13 pattern:$0x76325410] }
  0x21   : > { %v339_v31 = vor.u32 %v338_v25, %v335_v24  ;;  %v344_v32 = vrot.slane %v342_v26, 7  ;;  %v2136_v33 = vld.sshfl [vmem:[%s2576_s25 + $0xc] sm:$0x13 pattern:$0x76325410]  ;;  %v302_v34 = vcombine.high %v2135_v29, %v2135_v29  ;;  %v347_v35 = vshrl.u32 %v2135_v29, 16 }
  0x22   : > { %v326_v36 = vrot.slane %v325_v27, 2  ;;  %v310_v37 = vcombine.high %v2136_v33, %v2136_v33  ;;  %v350_v38 = vshll.u32 %v2135_v29, 16  ;;  %v361_v39 = vshrl.u32 %v2136_v33, 16 }
  0x23   : > { %v2417_v40 = vld.sshfl [vmem:[%s2576_s25 + $0x4] sm:$0x5f pattern:$0x76325410]  ;;  %v340_v41 = vrot.slane %v339_v31, 2  ;;  %v349_v42 = vrot.slane %v347_v35, 6  ;;  %458 = vrot.lane.b32.xlu0 %v2416_v20, %s2489_s28 }
  0x24   : > { %v356_v43 = vshll.u32 %v302_v34, 16  ;;  %v364_v44 = vshll.u32 %v2136_v33, 16  ;;  %v331_v45 = vsel %vm2595_vm6, %v326_v36, %v330_v28  ;;  %v352_v46 = vrot.slane %v350_v38, 7  ;;  %s2127_s28 = sshll.u32 %s2832_s13, 3 }
  0x25   : > { %v363_v47 = vrot.slane %v361_v39, 6  ;;  %v370_v48 = vshll.u32 %v310_v37, 16  ;;  %v2606_v49 = vsel %vm2595_vm6, %v340_v41, %v344_v32  ;;  %v2151_v52 = vld.sshfl [vmem:[%s2576_s25 + $0x30] sm:$0x13 pattern:$0x76325410] }
  0x26   : > { %v358_v50 = vrot.slane %v356_v43, 7  ;;  %v366_v51 = vrot.slane %v364_v44, 7  ;;  %v374_v53 = vcombine.low %v331_v45, %v2606_v49  ;;  %v353_v54 = vor.u32 %v352_v46, %v349_v42  ;;  %v2152_v56 = vld.sshfl [vmem:[%s2576_s25 + $0x34] sm:$0x13 pattern:$0x76325410] }
  0x27   : > { %v372_v55 = vrot.slane %v370_v48, 7  ;;  %v498_v57 = vcombine.high %v2151_v52, %v2151_v52  ;;  %v506_v59 = vcombine.high %v2152_v56, %v2152_v56  ;;  %v536_v60 = vshrl.u32 %v2151_v52, 16  ;;  %v2149_v62 = vld.sshfl [vmem:[%s2576_s25 + $0x28] sm:$0x13 pattern:$0x76325410]  ;;  %612 = vrot.lane.b32.xlu0 %v2417_v40, %s2490_s29 }
  0x28   : > { %v367_v58 = vor.u32 %v366_v51, %v363_v47  ;;  %v539_v61 = vshll.u32 %v2151_v52, 16  ;;  %v381_v63 = vrot.slane %v374_v53, %v2571_v5  ;;  %v354_v0 = vrot.slane %v353_v54, 2  ;;  %v2150_v15 = vld.sshfl [vmem:[%s2576_s25 + $0x2c] sm:$0x13 pattern:$0x76325410] }
  0x29   : > { %v545_v1 = vshll.u32 %v498_v57, 16  ;;  %v550_v2 = vshrl.u32 %v2152_v56, 16  ;;  %v538_v4 = vrot.slane %v536_v60, 6  ;;  %v553_v7 = vshll.u32 %v2152_v56, 16 }
  0x2a   : > { %v368_v3 = vrot.slane %v367_v58, 2  ;;  %v541_v6 = vrot.slane %v539_v61, 7  ;;  %390 = vrot.lane.b32.xlu1 %v381_v63, %s2491_s30  ;;  %v2616_v8 = vsel %vm2595_vm6, %v354_v0, %v358_v50  ;;  %v559_v11 = vshll.u32 %v506_v59, 16 }
  0x2b   : > { %v547_v9 = vrot.slane %v545_v1, 7  ;;  %v552_v10 = vrot.slane %v550_v2, 6  ;;  %v555_v14 = vrot.slane %v553_v7, 7  ;;  %v482_v16 = vcombine.high %v2149_v62, %v2149_v62 }
  0x2c   : > { %v2621_v12 = vsel %vm2595_vm6, %v368_v3, %v372_v55  ;;  %v542_v13 = vor.u32 %v541_v6, %v538_v4  ;;  %v561_v18 = vrot.slane %v559_v11, 7  ;;  %v490_v19 = vcombine.high %v2150_v15, %v2150_v15  ;;  %v2418_v36 = vld.sshfl [vmem:[%s2576_s25 + $0x20] sm:$0x5f pattern:$0x76325410] }
  0x2d   : > { %v382_v17 = vcombine.low %v2616_v8, %v2621_v12  ;;  %v508_v20 = vshrl.u32 %v2149_v62, 16  ;;  %v556_v22 = vor.u32 %v555_v14, %v552_v10  ;;  %v511_v23 = vshll.u32 %v2149_v62, 16  ;;  %v2631_v37 = vld.sshfl [vmem:[%s2576_s25 + $0x18] sm:$0x5f pattern:$0x76325410] }
  0x2e   : > { %v543_v21 = vrot.slane %v542_v13, 2  ;;  %v517_v24 = vshll.u32 %v482_v16, 16  ;;  %v522_v27 = vshrl.u32 %v2150_v15, 16  ;;  %v525_v28 = vshll.u32 %v2150_v15, 16 }
  0x2f   : > { %v389_v25 = vrot.slane %v382_v17, %v2571_v5  ;;  %v510_v26 = vrot.slane %v508_v20, 6  ;;  %v557_v31 = vrot.slane %v556_v22, 2  ;;  %v513_v32 = vrot.slane %v511_v23, 7 }
  0x30   : > { %v548_v29 = vsel %vm2595_vm6, %v543_v21, %v547_v9  ;;  %v524_v33 = vrot.slane %v522_v27, 6  ;;  %v527_v34 = vrot.slane %v525_v28, 7  ;;  %v531_v35 = vshll.u32 %v490_v19, 16 }
  0x31   : > { %392 = vrot.lane.b32.xlu1 %v389_v25, %s2491_s30  ;;  %v562_v38 = vsel %vm2595_vm6, %v557_v31, %v561_v18  ;;  %v514_v39 = vor.u32 %v513_v32, %v510_v26  ;;  %v519_v40 = vrot.slane %v517_v24, 7  ;;  %v2160_v41 = vld.sshfl [vmem:[%s2576_s25 + $0x10] sm:$0x13 pattern:$0x76325410]  ;;  %v750_v61 = vcombine.low %v2606_v49, %v2616_v8  ;;  %s2508_s30 = smov 88  }
  0x32   : > { %v571_v42 = vcombine.low %v548_v29, %v562_v38  ;;  %v528_v43 = vor.u32 %v527_v34, %v524_v33  ;;  %v533_v44 = vrot.slane %v531_v35, 7  ;;  %v693_v45 = vcombine.high %v2160_v41, %v2160_v41  ;;  %v2175_v58 = vld.sshfl [vmem:[%s2576_s25 + $0x58] sm:$0x13 pattern:$0x76325410] }
  0x33   : > { %v515_v46 = vrot.slane %v514_v39, 2  ;;  %v737_v47 = vshrl.u32 %v2160_v41, 16  ;;  %v740_v48 = vshll.u32 %v2160_v41, 16  ;;  %v874_v63 = vcombine.high %v2175_v58, %v2175_v58 }
  0x34   : > { %v578_v50 = vrot.slane %v571_v42, %v2571_v5  ;;  %v529_v51 = vrot.slane %v528_v43, 2  ;;  %v746_v52 = vshll.u32 %v693_v45, 16  ;;  %v2176_v62 = vld.sshfl [vmem:[%s2576_s25 + $0x5c] sm:$0x13 pattern:$0x76325410]  ;;  %v757_v15 = vrot.slane %v750_v61, %v2571_v5 }
  0x35   : > { %v520_v53 = vsel %vm2595_vm6, %v515_v46, %v519_v40  ;;  %v739_v54 = vrot.slane %v737_v47, 6  ;;  %v742_v55 = vrot.slane %v740_v48, 7  ;;  %v882_v0 = vcombine.high %v2176_v62, %v2176_v62  ;;  %v2420_v10 = vld.sshfl [vmem:[%s2576_s25 + $0x58] sm:$0x5f pattern:$0x76325410] }
  0x36   : > { %581 = vrot.lane.b32.xlu1 %v578_v50, %s2492_s4  ;;  %v534_v56 = vsel %vm2595_vm6, %v529_v51, %v533_v44  ;;  %v748_v57 = vrot.slane %v746_v52, 7  ;;  %v912_v1 = vshrl.u32 %v2175_v58, 16  ;;  %v915_v2 = vshll.u32 %v2175_v58, 16 }
  0x37   : > { %v563_v59 = vcombine.low %v520_v53, %v534_v56  ;;  %v743_v60 = vor.u32 %v742_v55, %v739_v54  ;;  %v926_v3 = vshrl.u32 %v2176_v62, 16  ;;  %v921_v7 = vshll.u32 %v874_v63, 16  ;;  %v2173_v18 = vld.sshfl [vmem:[%s2576_s25 + $0x50] sm:$0x13 pattern:$0x76325410] }
  0x38   : > { %v929_v9 = vshll.u32 %v2176_v62, 16  ;;  %v914_v11 = vrot.slane %v912_v1, 6  ;;  %v917_v49 = vrot.slane %v915_v2, 7  ;;  %v935_v13 = vshll.u32 %v882_v0, 16 }
  0x39   : > { %v570_v4 = vrot.slane %v563_v59, %v2571_v5  ;;  %v744_v6 = vrot.slane %v743_v60, 2  ;;  %v928_v8 = vrot.slane %v926_v3, 6  ;;  %v923_v16 = vrot.slane %v921_v7, 7 }
  0x3a   : > { %647 = vrot.lane.b32.xlu1 %v2418_v36, %s2493_s5  ;;  %v931_v17 = vrot.slane %v929_v9, 7  ;;  %v2421_v20 = vld.sshfl [vmem:[%s2576_s25 + $0x50] sm:$0x5f pattern:$0x76325410]  ;;  %v918_v21 = vor.u32 %v917_v49, %v914_v11  ;;  %v937_v22 = vrot.slane %v935_v13, 7  ;;  %v858_v24 = vcombine.high %v2173_v18, %v2173_v18 }
  0x3b   : > { %579 = vrot.lane.b32.xlu0 %v570_v4, %s2492_s4  ;;  %v749_v14 = vsel %vm2595_vm6, %v744_v6, %v748_v57  ;;  %v2174_v23 = vld.sshfl [vmem:[%s2576_s25 + $0x54] sm:$0x13 pattern:$0x76325410]  ;;  %v884_v28 = vshrl.u32 %v2173_v18, 16  ;;  %v887_v29 = vshll.u32 %v2173_v18, 16 }
  0x3c   : > { %v758_v19 = vcombine.low %v2621_v12, %v749_v14  ;;  %v2422_v25 = vld.sshfl [vmem:[%s2576_s25 + $0x6c] sm:$0x5f pattern:$0x76325410]  ;;  %v932_v26 = vor.u32 %v931_v17, %v928_v8  ;;  %v866_v27 = vcombine.high %v2174_v23, %v2174_v23  ;;  %v919_v32 = vrot.slane %v918_v21, 2 }
  0x3d   : > { %v893_v33 = vshll.u32 %v858_v24, 16  ;;  %v898_v34 = vshrl.u32 %v2174_v23, 16  ;;  %v886_v35 = vrot.slane %v884_v28, 6  ;;  %v889_v36 = vrot.slane %v887_v29, 7 }
  0x3e   : > { %v765_v31 = vrot.slane %v758_v19, %v2571_v5  ;;  %v933_v12 = vrot.slane %v932_v26, 2  ;;  %v901_v38 = vshll.u32 %v2174_v23, 16  ;;  %v2423_v39 = vld.sshfl [vmem:[%s2576_s25 + $0x64] sm:$0x5f pattern:$0x76325410]  ;;  %v2660_v40 = vsel %vm2595_vm6, %v919_v32, %v923_v16 }
  0x3f   : > { %645 = vrot.lane.b32.xlu0 %v2631_v37, %s2493_s5  ;;  %v900_v41 = vrot.slane %v898_v34, 6  ;;  %v907_v42 = vshll.u32 %v866_v27, 16  ;;  %v890_v37 = vor.u32 %v889_v36, %v886_v35  ;;  %v895_v44 = vrot.slane %v893_v33, 7 }
  0x40   : > { %768 = vrot.lane.b32.xlu1 %v765_v31, %s2494_s6  ;;  %v2664_v43 = vsel %vm2595_vm6, %v933_v12, %v937_v22  ;;  %v903_v45 = vrot.slane %v901_v38, 7  ;;  %v2191_v47 = vld.sshfl [vmem:[%s2576_s25 + $0x80] sm:$0x13 pattern:$0x76325410] }
  0x41   : > { %v947_v46 = vcombine.low %v2660_v40, %v2664_v43  ;;  %v891_v48 = vrot.slane %v890_v37, 2  ;;  %v909_v51 = vrot.slane %v907_v42, 7  ;;  %v2192_v52 = vld.sshfl [vmem:[%s2576_s25 + $0x84] sm:$0x13 pattern:$0x76325410]  ;;  %v1063_v53 = vcombine.high %v2191_v47, %v2191_v47 }
  0x42   : > { %v904_v50 = vor.u32 %v903_v45, %v900_v41  ;;  %v1071_v54 = vcombine.high %v2192_v52, %v2192_v52  ;;  %v1101_v55 = vshrl.u32 %v2191_v47, 16  ;;  %v1104_v56 = vshll.u32 %v2191_v47, 16  ;;  %v2189_v57 = vld.sshfl [vmem:[%s2576_s25 + $0x78] sm:$0x13 pattern:$0x76325410] }
  0x43   : > { %766 = vrot.lane.b32.xlu0 %v757_v15, %s2494_s6  ;;  %v896_v58 = vsel %vm2595_vm6, %v891_v48, %v895_v44  ;;  %v1110_v60 = vshll.u32 %v1063_v53, 16  ;;  %v1115_v61 = vshrl.u32 %v2192_v52, 16  ;;  %v2424_v62 = vld.sshfl [vmem:[%s2576_s25 + $0x80] sm:$0x5f pattern:$0x76325410]  ;;  %v954_v3 = vrot.slane %v947_v46, %v2571_v5 }
  0x44   : > { %802 = vrot.lane.b32.xlu1 %v2420_v10, %s2495_s7  ;;  %v905_v59 = vrot.slane %v904_v50, 2  ;;  %v1103_v63 = vrot.slane %v1101_v55, 6  ;;  %v1106_v0 = vrot.slane %v1104_v56, 7  ;;  %v1118_v1 = vshll.u32 %v2192_v52, 16  ;;  %s2510_s6 = smov 92  }
  0x45   : > { %v1124_v2 = vshll.u32 %v1071_v54, 16  ;;  %v1117_v6 = vrot.slane %v1115_v61, 6  ;;  %v2190_v7 = vld.sshfl [vmem:[%s2576_s25 + $0x7c] sm:$0x13 pattern:$0x76325410]  ;;  %v1047_v9 = vcombine.high %v2189_v57, %v2189_v57 }
  0x46   : > { %v2677_v4 = vsel %vm2595_vm6, %v905_v59, %v909_v51  ;;  %v2425_v11 = vld.sshfl [vmem:[%s2576_s25 + $0x78] sm:$0x5f pattern:$0x76325410]  ;;  %v1107_v49 = vor.u32 %v1106_v0, %v1103_v63  ;;  %v1112_v8 = vrot.slane %v1110_v60, 7  ;;  %v1120_v13 = vrot.slane %v1118_v1, 7 }
  0x47   : > { %800 = vrot.lane.b32.xlu0 %v2421_v20, %s2495_s7  ;;  %v939_v10 = vcombine.low %v896_v58, %v2677_v4  ;;  %v2426_v14 = vld.sshfl [vmem:[%s2576_s25 + $0x94] sm:$0x5f pattern:$0x76325410]  ;;  %v1055_v15 = vcombine.high %v2190_v7, %v2190_v7  ;;  %v1073_v16 = vshrl.u32 %v2189_v57, 16  ;;  %v1076_v17 = vshll.u32 %v2189_v57, 16 }
  0x48   : > { %836 = vrot.lane.b32.xlu1 %v2422_v25, %s2496_s8  ;;  %v1082_v18 = vshll.u32 %v1047_v9, 16  ;;  %v1108_v19 = vrot.slane %v1107_v49, 2  ;;  %v1121_v20 = vor.u32 %v1120_v13, %v1117_v6  ;;  %v1126_v21 = vrot.slane %v1124_v2, 7 }
  0x49   : > { %v1087_v22 = vshrl.u32 %v2190_v7, 16  ;;  %v946_v23 = vrot.slane %v939_v10, %v2571_v5  ;;  %v1075_v24 = vrot.slane %v1073_v16, 6  ;;  %v1078_v25 = vrot.slane %v1076_v17, 7 }
  0x4a   : > { %v1090_v26 = vshll.u32 %v2190_v7, 16  ;;  %v1122_v27 = vrot.slane %v1121_v20, 2  ;;  %v1096_v29 = vshll.u32 %v1055_v15, 16  ;;  %v1113_v31 = vsel %vm2595_vm6, %v1108_v19, %v1112_v8 }
  0x4b   : > { %834 = vrot.lane.b32.xlu0 %v2423_v39, %s2496_s8  ;;  %v1089_v28 = vrot.slane %v1087_v22, 6  ;;  %v1079_v32 = vor.u32 %v1078_v25, %v1075_v24  ;;  %v1084_v33 = vrot.slane %v1082_v18, 7  ;;  %v2427_v12 = vld.sshfl [vmem:[%s2576_s25 + $0x8c] sm:$0x5f pattern:$0x76325410]  ;;  %v1315_v20 = vcombine.low %v2677_v4, %v2660_v40 }
  0x4c   : > { %957 = vrot.lane.b32.xlu1 %v954_v3, %s2497_s9  ;;  %v1092_v34 = vrot.slane %v1090_v26, 7  ;;  %v1127_v35 = vsel %vm2595_vm6, %v1122_v27, %v1126_v21  ;;  %v1098_v39 = vrot.slane %v1096_v29, 7  ;;  %v2208_v41 = vld.sshfl [vmem:[%s2576_s25 + $0x60] sm:$0x13 pattern:$0x76325410] }
  0x4d   : > { %v1080_v36 = vrot.slane %v1079_v32, 2  ;;  %v1136_v42 = vcombine.low %v1113_v31, %v1127_v35  ;;  %v1258_v37 = vcombine.high %v2208_v41, %v2208_v41  ;;  %v1302_v44 = vshrl.u32 %v2208_v41, 16  ;;  %v2428_v53 = vld.sshfl [vmem:[%s2576_s25 + $0x5c] sm:$0x5f pattern:$0x76325410] }
  0x4e   : > { %v1093_v38 = vor.u32 %v1092_v34, %v1089_v28  ;;  %v1305_v45 = vshll.u32 %v2208_v41, 16  ;;  %v2429_v56 = vld.sshfl [vmem:[%s2576_s25 + $0x54] sm:$0x5f pattern:$0x76325410] }
  0x4f   : > { %955 = vrot.lane.b32.xlu0 %v946_v23, %s2497_s9  ;;  %v1085_v46 = vsel %vm2595_vm6, %v1080_v36, %v1084_v33  ;;  %v1304_v48 = vrot.slane %v1302_v44, 6  ;;  %v1311_v51 = vshll.u32 %v1258_v37, 16  ;;  %v1143_v54 = vrot.slane %v1136_v42, %v2571_v5  ;;  %v2430_v59 = vld.sshfl [vmem:[%s2576_s25 + $0x70] sm:$0x5f pattern:$0x76325410] }
  0x50   : > { %991 = vrot.lane.b32.xlu1 %v2424_v62, %s2498_s10  ;;  %v1094_v47 = vrot.slane %v1093_v38, 2  ;;  %v1307_v50 = vrot.slane %v1305_v45, 7  ;;  %v2223_v60 = vld.sshfl [vmem:[%s2576_s25 + $0xa8] sm:$0x13 pattern:$0x76325410]  ;;  %v1322_v45 = vrot.slane %v1315_v20, %v2571_v5 }
  0x51   : > { %v1313_v58 = vrot.slane %v1311_v51, 7  ;;  %v2224_v62 = vld.sshfl [vmem:[%s2576_s25 + $0xac] sm:$0x13 pattern:$0x76325410]  ;;  %v1439_v63 = vcombine.high %v2223_v60, %v2223_v60  ;;  %v1477_v0 = vshrl.u32 %v2223_v60, 16 }
  0x52   : > { %v1099_v52 = vsel %vm2595_vm6, %v1094_v47, %v1098_v39  ;;  %v1308_v57 = vor.u32 %v1307_v50, %v1304_v48  ;;  %v1447_v2 = vcombine.high %v2224_v62, %v2224_v62  ;;  %v1480_v3 = vshll.u32 %v2223_v60, 16  ;;  %v2221_v7 = vld.sshfl [vmem:[%s2576_s25 + $0xa0] sm:$0x13 pattern:$0x76325410]  ;;  %s2511_s9 = smov 96  }
  0x53   : > { %989 = vrot.lane.b32.xlu0 %v2425_v11, %s2498_s10  ;;  %v1128_v55 = vcombine.low %v1085_v46, %v1099_v52  ;;  %v1491_v6 = vshrl.u32 %v2224_v62, 16  ;;  %v2431_v9 = vld.sshfl [vmem:[%s2576_s25 + $0x68] sm:$0x5f pattern:$0x76325410]  ;;  %v1479_v11 = vrot.slane %v1477_v0, 6  ;;  %v1423_v18 = vcombine.high %v2221_v7, %v2221_v7 }
  0x54   : > { %1025 = vrot.lane.b32.xlu1 %v2426_v14, %s2499_s11  ;;  %v1309_v61 = vrot.slane %v1308_v57, 2  ;;  %v1494_v49 = vshll.u32 %v2224_v62, 16  ;;  %v1482_v8 = vrot.slane %v1480_v3, 7  ;;  %v1486_v13 = vshll.u32 %v1439_v63, 16 }
  0x55   : > { %v1135_v1 = vrot.slane %v1128_v55, %v2571_v5  ;;  %v1493_v14 = vrot.slane %v1491_v6, 6  ;;  %v1500_v16 = vshll.u32 %v1447_v2, 16  ;;  %v2222_v17 = vld.sshfl [vmem:[%s2576_s25 + $0xa4] sm:$0x13 pattern:$0x76325410] }
  0x56   : > { %v1314_v10 = vsel %vm2595_vm6, %v1309_v61, %v1313_v58  ;;  %v1496_v15 = vrot.slane %v1494_v49, 7  ;;  %v1483_v21 = vor.u32 %v1482_v8, %v1479_v11  ;;  %v2432_v22 = vld.sshfl [vmem:[%s2576_s25 + $0xa8] sm:$0x5f pattern:$0x76325410]  ;;  %v1431_v24 = vcombine.high %v2222_v17, %v2222_v17 }
  0x57   : > { %1023 = vrot.lane.b32.xlu0 %v2427_v12, %s2499_s11  ;;  %v1323_v19 = vcombine.low %v2664_v43, %v1314_v10  ;;  %v1449_v25 = vshrl.u32 %v2221_v7, 16  ;;  %v1452_v26 = vshll.u32 %v2221_v7, 16  ;;  %v2711_v27 = vld.sshfl [vmem:[%s2576_s25 + $0xa0] sm:$0x5f pattern:$0x76325410] }
  0x58   : > { %1146 = vrot.lane.b32.xlu1 %v1143_v54, %s2500_s19  ;;  %v1497_v23 = vor.u32 %v1496_v15, %v1493_v14  ;;  %v1458_v28 = vshll.u32 %v1423_v18, 16  ;;  %v1463_v29 = vshrl.u32 %v2222_v17, 16  ;;  %v1466_v31 = vshll.u32 %v2222_v17, 16 }
  0x59   : > { %v1488_v32 = vrot.slane %v1486_v13, 7  ;;  %v1502_v33 = vrot.slane %v1500_v16, 7  ;;  %v1451_v43 = vrot.slane %v1449_v25, 6  ;;  %v1454_v34 = vrot.slane %v1452_v26, 7 }
  0x5a   : > { %v2434_v40 = vld.sshfl [vmem:[%s2576_s25 + $0xbc] sm:$0x5f pattern:$0x76325410]  ;;  %v1484_v4 = vrot.slane %v1483_v21, 2  ;;  %v1498_v12 = vrot.slane %v1497_v23, 2  ;;  %v1330_v38 = vrot.slane %v1323_v19, %v2571_v5 }
  0x5b   : > { %1144 = vrot.lane.b32.xlu0 %v1135_v1, %s2500_s19  ;;  %v1465_v35 = vrot.slane %v1463_v29, 6  ;;  %v1468_v36 = vrot.slane %v1466_v31, 7  ;;  %v1455_v39 = vor.u32 %v1454_v34, %v1451_v43  ;;  %v1472_v41 = vshll.u32 %v1431_v24, 16  ;;  %s2513_s19 = smov 100  }
  0x5c   : > { %1179 = vrot.lane.b32.xlu1 %v2428_v53, %s2501_s20  ;;  %v1460_v42 = vrot.slane %v1458_v28, 7  ;;  %v2239_v44 = vld.sshfl [vmem:[%s2576_s25 + $0xd0] sm:$0x13 pattern:$0x76325410]  ;;  %v2720_v50 = vsel %vm2595_vm6, %v1484_v4, %v1488_v32  ;;  %v2724_v51 = vsel %vm2595_vm6, %v1498_v12, %v1502_v33 }
  0x5d   : > { %v1469_v37 = vor.u32 %v1468_v36, %v1465_v35  ;;  %v1456_v46 = vrot.slane %v1455_v39, 2  ;;  %v2240_v47 = vld.sshfl [vmem:[%s2576_s25 + $0xd4] sm:$0x13 pattern:$0x76325410]  ;;  %v1666_v48 = vshrl.u32 %v2239_v44, 16  ;;  %v1628_v52 = vcombine.high %v2239_v44, %v2239_v44 }
  0x5e   : > { %v2237_v53 = vld.sshfl [vmem:[%s2576_s25 + $0xc8] sm:$0x13 pattern:$0x76325410]  ;;  %v1474_v55 = vrot.slane %v1472_v41, 7  ;;  %v1669_v57 = vshll.u32 %v2239_v44, 16  ;;  %v1636_v58 = vcombine.high %v2240_v47, %v2240_v47  ;;  %v1512_v61 = vcombine.low %v2720_v50, %v2724_v51 }
  0x5f   : > { %1177 = vrot.lane.b32.xlu0 %v2429_v56, %s2501_s20  ;;  %v1470_v54 = vrot.slane %v1469_v37, 2  ;;  %v1668_v56 = vrot.slane %v1666_v48, 6  ;;  %v1683_v60 = vshll.u32 %v2240_v47, 16  ;;  %v1461_v62 = vsel %vm2595_vm6, %v1456_v46, %v1460_v42 }
  0x60   : > { %1212 = vrot.lane.b32.xlu1 %v2430_v59, %s2502_s21  ;;  %v1680_v59 = vshrl.u32 %v2240_v47, 16  ;;  %v1671_v63 = vrot.slane %v1669_v57, 7  ;;  %v2238_v0 = vld.sshfl [vmem:[%s2576_s25 + $0xcc] sm:$0x13 pattern:$0x76325410]  ;;  %v1612_v1 = vcombine.high %v2237_v53, %v2237_v53  ;;  %v1519_v24 = vrot.slane %v1512_v61, %v2571_v5 }
  0x61   : > { %v2435_v2 = vld.sshfl [vmem:[%s2576_s25 + $0xb4] sm:$0x5f pattern:$0x76325410]  ;;  %v1675_v3 = vshll.u32 %v1628_v52, 16  ;;  %v1685_v7 = vrot.slane %v1683_v60, 7  ;;  %v2735_v10 = vsel %vm2595_vm6, %v1470_v54, %v1474_v55 }
  0x62   : > { %v1682_v6 = vrot.slane %v1680_v59, 6  ;;  %v1672_v11 = vor.u32 %v1671_v63, %v1668_v56  ;;  %v1638_v49 = vshrl.u32 %v2237_v53, 16  ;;  %v1641_v8 = vshll.u32 %v2237_v53, 16  ;;  %v2402_v57 = vld [vmem:[%s2816_s1 + $0x30] sm:$0x3f]  }
  0x63   : > { %1210 = vrot.lane.b32.xlu0 %v2431_v9, %s2502_s21  ;;  %v1620_v9 = vcombine.high %v2238_v0, %v2238_v0  ;;  %v1689_v14 = vshll.u32 %v1636_v58, 16  ;;  %v1652_v15 = vshrl.u32 %v2238_v0, 16  ;;  %v1655_v16 = vshll.u32 %v2238_v0, 16  ;;  %s2514_s21 = smov 104  }
  0x64   : > { %1333 = vrot.lane.b32.xlu1 %v1330_v38, %s2503_s22  ;;  %v1686_v13 = vor.u32 %v1685_v7, %v1682_v6  ;;  %v1640_v17 = vrot.slane %v1638_v49, 6  ;;  %v1643_v18 = vrot.slane %v1641_v8, 7  ;;  %v1647_v19 = vshll.u32 %v1612_v1, 16  ;;  %v2403_v1 = vld [vmem:[%s2816_s1 + $0x28] sm:$0xff]  }
  0x65   : > { %v1661_v20 = vshll.u32 %v1620_v9, 16  ;;  %v1504_v21 = vcombine.low %v1461_v62, %v2735_v10  ;;  %v1657_v23 = vrot.slane %v1655_v16, 7  ;;  %v2436_v25 = vld.sshfl [vmem:[%s2576_s25 + $0xd0] sm:$0x5f pattern:$0x76325410]  ;;  %v1880_v8 = vcombine.low %v2735_v10, %v2720_v50 }
  0x66   : > { %v1673_v26 = vrot.slane %v1672_v11, 2  ;;  %v1677_v28 = vrot.slane %v1675_v3, 7  ;;  %v1644_v29 = vor.u32 %v1643_v18, %v1640_v17  ;;  %v2438_v31 = vld.sshfl [vmem:[%s2576_s25 + $0xc8] sm:$0x5f pattern:$0x76325410] }
  0x67   : > { %1331 = vrot.lane.b32.xlu0 %v1322_v45, %s2503_s22  ;;  %v1687_v32 = vrot.slane %v1686_v13, 2  ;;  %v1691_v33 = vrot.slane %v1689_v14, 7  ;;  %v2440_v34 = vld.sshfl [vmem:[%s2576_s25 + $0xe4] sm:$0x5f pattern:$0x76325410]  ;;  %v1887_v14 = vrot.slane %v1880_v8, %v2571_v5 }
  0x68   : > { %1367 = vrot.lane.b32.xlu1 %v2432_v22, %s2504_s23  ;;  %v1654_v22 = vrot.slane %v1652_v15, 6  ;;  %v1663_v4 = vrot.slane %v1661_v20, 7  ;;  %v2256_v12 = vld.sshfl [vmem:[%s2576_s25 + $0xb0] sm:$0x13 pattern:$0x76325410]  ;;  %v1678_v39 = vsel %vm2595_vm6, %v1673_v26, %v1677_v28 }
  0x69   : > { %v1645_v35 = vrot.slane %v1644_v29, 2  ;;  %v1867_v36 = vshrl.u32 %v2256_v12, 16  ;;  %v2437_v38 = vld.sshfl [vmem:[%s2576_s25] sm:$0x5f pattern:$0x76325410]  ;;  %v1692_v37 = vsel %vm2595_vm6, %v1687_v32, %v1691_v33  ;;  %v1823_v44 = vcombine.high %v2256_v12, %v2256_v12 }
  0x6a   : > { %v1658_v43 = vor.u32 %v1657_v23, %v1654_v22  ;;  %v1870_v42 = vshll.u32 %v2256_v12, 16  ;;  %v2439_v46 = vld.sshfl [vmem:[%s2576_s25 + $0x8] sm:$0x5f pattern:$0x76325410]  ;;  %v1701_v52 = vcombine.low %v1678_v39, %v1692_v37  ;;  %v2509_v61 = vmov 0.0  }
  0x6b   : > { %1365 = vrot.lane.b32.xlu0 %v2711_v27, %s2504_s23  ;;  %v1649_v27 = vrot.slane %v1647_v19, 7  ;;  %v1869_v45 = vrot.slane %v1867_v36, 6  ;;  %v2441_v48 = vld.sshfl [vmem:[%s2576_s25 + $0xdc] sm:$0x5f pattern:$0x76325410]  ;;  %2277 = vmatprep.subr.bf16.mxu0 %v2509_v61 }
  0x6c   : > { %1401 = vrot.lane.b32.xlu1 %v2434_v40, %s2505_s24  ;;  %v1511_v40 = vrot.slane %v1504_v21, %v2571_v5  ;;  %v1659_v41 = vrot.slane %v1658_v43, 2  ;;  %v1872_v47 = vrot.slane %v1870_v42, 7  ;;  %235 = vst.msk [vmem:[#allocation2] sm:$0xf] %vm234_vm7, %v2437_v38  ;;  %v1876_v56 = vshll.u32 %v1823_v44, 16  ;;  %v2404_v9 = vld [vmem:[%s2816_s1 + $0x20] sm:$0xff]   ;;  %2291 = vmatprep.mubr.msk.bf16.mxu0 %vm2512_vm9, %v2509_v61 }
  0x6d   : > { %v1650_v53 = vsel %vm2595_vm6, %v1645_v35, %v1649_v27  ;;  %236 = vst.msk [vmem:[#allocation2 + $0x4] sm:$0xf] %vm234_vm7, %v2439_v46  ;;  %v1708_v59 = vrot.slane %v1701_v52, %v2571_v5  ;;  %v2442_v60 = vld.sshfl [vmem:[%s2576_s25 + $0xac] sm:$0x5f pattern:$0x76325410] }
  0x6e   : > { %v1664_v54 = vsel %vm2595_vm6, %v1659_v41, %v1663_v4  ;;  %v1873_v55 = vor.u32 %v1872_v47, %v1869_v45  ;;  %v1878_v63 = vrot.slane %v1876_v56, 7  ;;  %v1980_v0 = vsel %vm1978_vm8, %v2402_v57, 0  ;;  %v2443_v3 = vld.sshfl [vmem:[%s2576_s25 + $0xa4] sm:$0x5f pattern:$0x76325410] }
  0x6f   : > { %1399 = vrot.lane.b32.xlu0 %v2435_v2, %s2505_s24  ;;  %v1693_v58 = vcombine.low %v1650_v53, %v1664_v54  ;;  %2278 = vmatpush3.bf16.msra.mxu0 %v1980_v0  ;;  %v2444_v6 = vld.sshfl [vmem:[%s2576_s25 + $0xc0] sm:$0x5f pattern:$0x76325410]  ;;  %v2407_v50 = vld [vmem:[%s2816_s1 + $0x8] sm:$0xff]   ;;  %vm1150_vm7 = vcmask 486848  }
  0x70   : > { %1522 = vrot.lane.b32.xlu1 %v1519_v24, %s2506_s26  ;;  %v1874_v62 = vrot.slane %v1873_v55, 2  ;;  %2279 = vmatprep.subr.bf16.mxu0 %v2509_v61  ;;  %v2445_v11 = vld.sshfl [vmem:[%s2576_s25 + $0xb8] sm:$0x5f pattern:$0x76325410]  ;;  %v2408_v16 = vld [vmem:[%s2816_s1] sm:$0xff]  }
  0x71   : > { %v1700_v2 = vrot.slane %v1693_v58, %v2571_v5  ;;  %vm1183_vm8 = vcmask 519648   ;;  %vm1216_vm9 = vcmask 552448  }
  0x72   : > { %v1879_v7 = vsel %vm2595_vm6, %v1874_v62, %v1878_v63  ;;  %vm1029_vm6 = vcmask 454048  }
  0x73   : > { %1520 = vrot.lane.b32.xlu0 %v1511_v40, %s2506_s26  ;;  %2280 = vmatpush3.bf16.msra.mxu0 %v2403_v1  ;;  %v1888_v49 = vcombine.low %v2724_v51, %v1879_v7  ;;  %v2406_v51 = vld [vmem:[%s2816_s1 + $0x10] sm:$0xff]   ;;  %v2257_v7 = vld [vmem:[%s2817_s2] ss:$0 sm:$0xff] }
  0x74   : > { %1556 = vrot.lane.b32.xlu1 %v2436_v25, %s2507_s27  ;;  %2281 = vmatprep.subr.bf16.mxu0 %v2509_v61 }
  0x75   : > { %v1895_v13 = vrot.slane %v1888_v49, %v2571_v5 }
  0x77   : > { %1554 = vrot.lane.b32.xlu0 %v2438_v31, %s2507_s27  ;;  %2282 = vmatpush3.bf16.msra.mxu0 %v2404_v9  ;;  %s2126_s27 = sshll.u32 %s2834_s12, 1 }
  0x78   : > { %1590 = vrot.lane.b32.xlu1 %v2440_v34, %s2508_s30  ;;  %2283 = vmatprep.subr.bf16.mxu0 %v2509_v61  ;;  %s204_s29 = sadd.s32 %s2127_s28, %s2126_s27 }
  0x7b   : > { %1588 = vrot.lane.b32.xlu0 %v2441_v48, %s2508_s30  ;;  %2284 = vmatpush3.bf16.msra.mxu0 %v2405_v30  ;;  %s2128_s30 = sshll.u32 %s204_s29, 3 }
  0x7c   : > { %1711 = vrot.lane.b32.xlu1 %v1708_v59, %s2510_s6  ;;  %2285 = vmatprep.subr.bf16.mxu0 %v2509_v61  ;;  %s206_s8 = scalar_lea.vmem %s2818_s3, %s2128_s30 }
  0x7f   : > { %1709 = vrot.lane.b32.xlu0 %v1700_v2, %s2510_s6  ;;  %2286 = vmatpush3.bf16.msra.mxu0 %v2406_v51 }
  0x80   : > { %1744 = vrot.lane.b32.xlu1 %v2442_v60, %s2511_s9  ;;  %2287 = vmatprep.subr.bf16.mxu0 %v2509_v61 }
  0x83   : > { %1742 = vrot.lane.b32.xlu0 %v2443_v3, %s2511_s9  ;;  %2288 = vmatpush3.bf16.msra.mxu0 %v2407_v50 }
  0x84   : > { %1777 = vrot.lane.b32.xlu1 %v2444_v6, %s2513_s19  ;;  %2289 = vmatprep.subr.bf16.mxu0 %v2509_v61 }
  0x87   : > { %1775 = vrot.lane.b32.xlu0 %v2445_v11, %s2513_s19  ;;  %2290 = vmatpush3.bf16.msra.mxu0 %v2408_v16 }
  0x88   : > { %1898 = vrot.lane.b32.xlu1 %v1895_v13, %s2514_s21  ;;  %v427_v10 = vpop.permute.xlu1 %426 }
  0x89   : > { %v263_v15 = vpop.permute.xlu0 %262 }
  0x8a   : > { %269 = vst.msk [vmem:[#allocation2] sm:$0xf] %vm268_vm10, %v263_v15 }
  0x8b   : > { %1896 = vrot.lane.b32.xlu0 %v1887_v14, %s2514_s21 }
  0x8c   : > { %v461_v5 = vpop.permute.xlu1 %460 }
  0x8d   : > { %v265_v17 = vpop.permute.xlu0 %264 }
  0x8e   : > { %270 = vst.msk [vmem:[#allocation2 + $0x4] sm:$0xf] %vm268_vm10, %v265_v17  ;;  %vm1337_vm10 = vcmask 585248  }
  0x90   : > { %v615_v18 = vpop.permute.xlu1 %614 }
  0x91   : > { %v425_v19 = vpop.permute.xlu0 %424 }
  0x95   : > { %v459_v21 = vpop.permute.xlu0 %458 }
  0x99   : > { %v613_v23 = vpop.permute.xlu0 %612 }
  0x9c   : > { %v391_v20 = vpop.permute.xlu1 %390 }
  0x9d   : > { %397 = vst.msk [vmem:[#allocation2] sm:$0xf] %vm396_vm11, %v391_v20 }
  0x9e   : > { %431 = vst.msk [vmem:[#allocation2] sm:$0xf] %vm430_vm12, %v425_v19 }
  0x9f   : > { %465 = vst.msk [vmem:[#allocation2] sm:$0xf] %vm464_vm13, %v459_v21 }
  0xa3   : > { %v393_v22 = vpop.permute.xlu1 %392 }
  0xa4   : > { %398 = vst.msk [vmem:[#allocation2 + $0x4] sm:$0xf] %vm396_vm11, %v393_v22  ;;  %vm1371_vm11 = vcmask 618048  }
  0xa5   : > { %432 = vst.msk [vmem:[#allocation2 + $0x4] sm:$0xf] %vm430_vm12, %v427_v10  ;;  %vm1405_vm12 = vcmask 650848  }
  0xa6   : > { %466 = vst.msk [vmem:[#allocation2 + $0x4] sm:$0xf] %vm464_vm13, %v461_v5  ;;  %vm1526_vm13 = vcmask 683648  }
  0xa8   : > { %v582_v24 = vpop.permute.xlu1 %581 }
  0xa9   : > { %587 = vst.msk [vmem:[#allocation2 + $0x4] sm:$0xf] %vm585_vm14, %v582_v24 }
  0xaa   : > { %620 = vst.msk [vmem:[#allocation2 + $0x4] sm:$0xf] %vm618_vm15, %v615_v18 }
  0xac   : > { %v648_v25 = vpop.permute.xlu1 %647 }
  0xad   : > { %v580_v26 = vpop.permute.xlu0 %579  ;;  %653 = vst.msk [vmem:[#allocation2 + $0x4] sm:$0xf] %vm651_vm0, %v648_v25 }
  0xae   : > { %586 = vst.msk [vmem:[#allocation2] sm:$0xf] %vm585_vm14, %v580_v26  ;;  %vm1560_vm14 = vcmask 716448  }
  0xaf   : > { %619 = vst.msk [vmem:[#allocation2] sm:$0xf] %vm618_vm15, %v613_v23  ;;  %vm1594_vm15 = vcmask 749248  }
  0xb1   : > { %v646_v28 = vpop.permute.xlu0 %645 }
  0xb2   : > { %652 = vst.msk [vmem:[#allocation2] sm:$0xf] %vm651_vm0, %v646_v28  ;;  %v769_v29 = vpop.permute.xlu1 %768  ;;  %vm1715_vm0 = vcmask 782048  }
  0xb3   : > { %774 = vst.msk [vmem:[#allocation2 + $0x4] sm:$0xf] %vm772_vm1, %v769_v29 }
  0xb5   : > { %v767_v31 = vpop.permute.xlu0 %766 }
  0xb6   : > { %773 = vst.msk [vmem:[#allocation2] sm:$0xf] %vm772_vm1, %v767_v31  ;;  %v803_v32 = vpop.permute.xlu1 %802  ;;  %vm1748_vm1 = vcmask 814848  }
  0xb7   : > { %808 = vst.msk [vmem:[#allocation2 + $0x4] sm:$0xf] %vm806_vm2, %v803_v32 }
  0xb9   : > { %v801_v33 = vpop.permute.xlu0 %800 }
  0xba   : > { %807 = vst.msk [vmem:[#allocation2] sm:$0xf] %vm806_vm2, %v801_v33  ;;  %v837_v43 = vpop.permute.xlu1 %836  ;;  %vm1781_vm2 = vcmask 847648  }
  0xbb   : > { %842 = vst.msk [vmem:[#allocation2 + $0x4] sm:$0xf] %vm840_vm3, %v837_v43 }
  0xbd   : > { %v835_v34 = vpop.permute.xlu0 %834 }
  0xbe   : > { %841 = vst.msk [vmem:[#allocation2] sm:$0xf] %vm840_vm3, %v835_v34  ;;  %v958_v27 = vpop.permute.xlu1 %957  ;;  %vm1902_vm3 = vcmask 880448  }
  0xbf   : > { %963 = vst.msk [vmem:[#allocation2 + $0x4] sm:$0xf] %vm961_vm4, %v958_v27 }
  0xc1   : > { %v956_v4 = vpop.permute.xlu0 %955 }
  0xc2   : > { %962 = vst.msk [vmem:[#allocation2] sm:$0xf] %vm961_vm4, %v956_v4  ;;  %v992_v12 = vpop.permute.xlu1 %991  ;;  %vm1974_vm4 = vcmask 883712  }
  0xc3   : > { %997 = vst.msk [vmem:[#allocation2 + $0x4] sm:$0xf] %vm995_vm5, %v992_v12 }
  0xc5   : > { %v990_v40 = vpop.permute.xlu0 %989 }
  0xc6   : > { %996 = vst.msk [vmem:[#allocation2] sm:$0xf] %vm995_vm5, %v990_v40  ;;  %v1026_v35 = vpop.permute.xlu1 %1025 }
  0xc7   : > { %1031 = vst.msk [vmem:[#allocation2 + $0x4] sm:$0xf] %vm1029_vm6, %v1026_v35 }
  0xc9   : > { %v1024_v36 = vpop.permute.xlu0 %1023 }
  0xca   : > { %1030 = vst.msk [vmem:[#allocation2] sm:$0xf] %vm1029_vm6, %v1024_v36  ;;  %v1147_v38 = vpop.permute.xlu1 %1146 }
  0xcb   : > { %1152 = vst.msk [vmem:[#allocation2 + $0x4] sm:$0xf] %vm1150_vm7, %v1147_v38 }
  0xcd   : > { %v1145_v39 = vpop.permute.xlu0 %1144 }
  0xce   : > { %1151 = vst.msk [vmem:[#allocation2] sm:$0xf] %vm1150_vm7, %v1145_v39  ;;  %v1180_v41 = vpop.permute.xlu1 %1179 }
  0xcf   : > { %1185 = vst.msk [vmem:[#allocation2 + $0x4] sm:$0xf] %vm1183_vm8, %v1180_v41 }
  0xd1   : > { %v1178_v42 = vpop.permute.xlu0 %1177 }
  0xd2   : > { %1184 = vst.msk [vmem:[#allocation2] sm:$0xf] %vm1183_vm8, %v1178_v42  ;;  %v1213_v37 = vpop.permute.xlu1 %1212 }
  0xd3   : > { %1218 = vst.msk [vmem:[#allocation2 + $0x4] sm:$0xf] %vm1216_vm9, %v1213_v37 }
  0xd5   : > { %v1211_v44 = vpop.permute.xlu0 %1210 }
  0xd6   : > { %1217 = vst.msk [vmem:[#allocation2] sm:$0xf] %vm1216_vm9, %v1211_v44  ;;  %v1334_v45 = vpop.permute.xlu1 %1333 }
  0xd7   : > { %1339 = vst.msk [vmem:[#allocation2 + $0x4] sm:$0xf] %vm1337_vm10, %v1334_v45 }
  0xd9   : > { %v1332_v46 = vpop.permute.xlu0 %1331 }
  0xda   : > { %1338 = vst.msk [vmem:[#allocation2] sm:$0xf] %vm1337_vm10, %v1332_v46  ;;  %v1368_v47 = vpop.permute.xlu1 %1367 }
  0xdb   : > { %1373 = vst.msk [vmem:[#allocation2 + $0x4] sm:$0xf] %vm1371_vm11, %v1368_v47 }
  0xdd   : > { %v1366_v48 = vpop.permute.xlu0 %1365 }
  0xde   : > { %1372 = vst.msk [vmem:[#allocation2] sm:$0xf] %vm1371_vm11, %v1366_v48  ;;  %v1402_v52 = vpop.permute.xlu1 %1401 }
  0xdf   : > { %1407 = vst.msk [vmem:[#allocation2 + $0x4] sm:$0xf] %vm1405_vm12, %v1402_v52 }
  0xe1   : > { %v1400_v53 = vpop.permute.xlu0 %1399 }
  0xe2   : > { %1406 = vst.msk [vmem:[#allocation2] sm:$0xf] %vm1405_vm12, %v1400_v53  ;;  %v1523_v54 = vpop.permute.xlu1 %1522 }
  0xe3   : > { %1528 = vst.msk [vmem:[#allocation2 + $0x4] sm:$0xf] %vm1526_vm13, %v1523_v54 }
  0xe5   : > { %v1521_v55 = vpop.permute.xlu0 %1520 }
  0xe6   : > { %1527 = vst.msk [vmem:[#allocation2] sm:$0xf] %vm1526_vm13, %v1521_v55  ;;  %v1557_v56 = vpop.permute.xlu1 %1556 }
  0xe7   : > { %1562 = vst.msk [vmem:[#allocation2 + $0x4] sm:$0xf] %vm1560_vm14, %v1557_v56 }
  0xe9   : > { %v1555_v57 = vpop.permute.xlu0 %1554 }
  0xea   : > { %1561 = vst.msk [vmem:[#allocation2] sm:$0xf] %vm1560_vm14, %v1555_v57  ;;  %v1591_v58 = vpop.permute.xlu1 %1590 }
  0xeb   : > { %1596 = vst.msk [vmem:[#allocation2 + $0x4] sm:$0xf] %vm1594_vm15, %v1591_v58 }
  0xed   : > { %v1589_v59 = vpop.permute.xlu0 %1588 }
  0xee   : > { %1595 = vst.msk [vmem:[#allocation2] sm:$0xf] %vm1594_vm15, %v1589_v59  ;;  %v1712_v60 = vpop.permute.xlu1 %1711 }
  0xef   : > { %1717 = vst.msk [vmem:[#allocation2 + $0x4] sm:$0xf] %vm1715_vm0, %v1712_v60 }
  0xf1   : > { %v1710_v61 = vpop.permute.xlu0 %1709 }
  0xf2   : > { %1716 = vst.msk [vmem:[#allocation2] sm:$0xf] %vm1715_vm0, %v1710_v61  ;;  %v1745_v62 = vpop.permute.xlu1 %1744 }
  0xf3   : > { %1750 = vst.msk [vmem:[#allocation2 + $0x4] sm:$0xf] %vm1748_vm1, %v1745_v62 }
  0xf5   : > { %v1743_v63 = vpop.permute.xlu0 %1742 }
  0xf6   : > { %1749 = vst.msk [vmem:[#allocation2] sm:$0xf] %vm1748_vm1, %v1743_v63  ;;  %v1778_v0 = vpop.permute.xlu1 %1777 }
  0xf7   : > { %1783 = vst.msk [vmem:[#allocation2 + $0x4] sm:$0xf] %vm1781_vm2, %v1778_v0 }
  0xf9   : > { %v1776_v1 = vpop.permute.xlu0 %1775 }
  0xfa   : > { %1782 = vst.msk [vmem:[#allocation2] sm:$0xf] %vm1781_vm2, %v1776_v1  ;;  %v1899_v2 = vpop.permute.xlu1 %1898 }
  0xfb   : > { %1904 = vst.msk [vmem:[#allocation2 + $0x4] sm:$0xf] %vm1902_vm3, %v1899_v2 }
  0xfd   : > { %v1897_v3 = vpop.permute.xlu0 %1896 }
  0xfe   : > { %1903 = vst.msk [vmem:[#allocation2] sm:$0xf] %vm1902_vm3, %v1897_v3 }
 0x105   : > { %v2409_v6 = vld [vmem:[#allocation2] sm:$0xff]  }
 0x106   : > { %2292 = vmatmul.mubr.msk.bf16.vlgmr.msra.gmra.mxu0 %vm1974_vm4, %v2409_v6 }
 0x1c6   : > { %v2016_v9 = vpop.f32.mrf.mxu0 }
 0x1c7   : > { %v2017_v11 = vadd.f32 %v2257_v7, %v2016_v9 }
 0x1c8   : > { %v2293_v49 = vpop.f32.mrf.mxu0 }
 0x1c9   : > { %2023 = vst [vmem:[%s206_s8] sm:$0xff] %v2017_v11 }
 0x1ca   : > { %v2019_v30 = vpop.f32.mrf.mxu0 }
 0x1cb   : > { %v2020_v8 = vadd.f32 %v2257_v7, %v2019_v30 }
 0x1cc   : > { %v2294_v13 = vpop.f32.mrf.mxu0 }
 0x1cd   : > { %2024 = vst [vmem:[%s206_s8 + $0x8] sm:$0xff] %v2020_v8 }
 0x1ce PF: > { %s13_s16 = sadd.s32 1, %s2484_s16   ;;  %s2821_s12 = smov %s2476_s14 }
 0x1cf   : > { %p10_p7 = scmp.ge.s32.totalorder %s13_s16, 10   ;;  %s2822_s13 = smov %s2480_s15 }
 0x1d0   : > { %s2823_s14 = smov %s2826_s17  ;;  %s2824_s15 = smov %s2830_s18 }
 0x1d1   :  { %12 = sbr.rel (!%p10_p7) target bundleno = 3 (0x3), region = 73 }

</bundles_post_ra>
